<compile_context>
chip_gen: v5e
topology: v5e:2x2
jax: 0.10.0
libtpu: 0.0.40
codegen_flags: <defaults>
</compile_context>

<pallas_src>
import math
import functools

import jax
import jax.numpy as jnp
from jax.experimental import pallas as pl
from jax.experimental.pallas import tpu as pltpu


_STACKED_KEYS = ('w_in', 'b_in', 'w_out', 'b_out', 'ln1_g', 'ln1_b',
                 'w_fc1', 'b_fc1', 'w_fc2', 'b_fc2', 'ln2_g', 'ln2_b')


# ----------------------------------------------------------------------------
# Fused kernel: one grid step == one batch element's full forward pass
# ----------------------------------------------------------------------------
def _fused_primitive_kernel(val_ref, coord_ref, pos_ref, init_ref,
                            w_in_ref, b_in_ref, w_out_ref, b_out_ref,
                            ln1_g_ref, ln1_b_ref,
                            w_fc1_ref, b_fc1_ref, w_fc2_ref, b_fc2_ref,
                            ln2_g_ref, ln2_b_ref,
                            out_w_ref, out_b_ref,
                            o_ref, *, num_layers, num_heads, eps):
    S = val_ref.shape[1]
    E = val_ref.shape[2]
    Dh = E // num_heads
    scale = 1.0 / math.sqrt(Dh)

    # ---- token embedding sum + init_embedding at time step 0 (all in VMEM) ----
    x = (val_ref[0].astype(jnp.float32)
         + coord_ref[0].astype(jnp.float32)
         + pos_ref[0].astype(jnp.float32))                       # (S, E)
    is_t0 = (jax.lax.broadcasted_iota(jnp.int32, (S, 1), 0) == 0)
    x = x + jnp.where(is_t0, 1.0, 0.0).astype(jnp.float32) * init_ref[0]

    # ---- causal mask: built ONCE per invocation, shared by all layers & heads ----
    row = jax.lax.broadcasted_iota(jnp.int32, (S, S), 0)
    col = jax.lax.broadcasted_iota(jnp.int32, (S, S), 1)
    neg_mask = jnp.where(col > row, -1e30, 0.0).astype(jnp.float32)

    def layer_norm(v, g, b):
        mean = jnp.mean(v, axis=-1, keepdims=True)
        var = jnp.mean((v - mean) ** 2, axis=-1, keepdims=True)  # biased, PyTorch-style
        return (v - mean) * jax.lax.rsqrt(var + eps) * g + b

    for l in range(num_layers):
        # --- fused QKV projection ---
        qkv = jnp.dot(x, w_in_ref[l], preferred_element_type=jnp.float32) + b_in_ref[l]
        q = qkv[:, 0:E] * scale               # fold 1/sqrt(Dh) into Q (as PyTorch does)
        k = qkv[:, E:2 * E]
        v = qkv[:, 2 * E:3 * E]

        # --- multi-head causal attention; heads are static lane slices of qkv ---
        w_out = w_out_ref[l]                  # (E, E)
        attn = jnp.zeros((S, E), jnp.float32)
        for h in range(num_heads):
            sl = slice(h * Dh, (h + 1) * Dh)
            q_h, k_h, v_h = q[:, sl], k[:, sl], v[:, sl]
            # contract last dims directly: no explicit transpose of K
            s = jax.lax.dot_general(q_h, k_h, (((1,), (1,)), ((), ())),
                                    preferred_element_type=jnp.float32)   # (S, S)
            s = s + neg_mask
            m = jnp.max(s, axis=-1, keepdims=True)
            p = jnp.exp(s - m)
            denom = jnp.sum(p, axis=-1, keepdims=True)
            o_h = jnp.dot(p, v_h, preferred_element_type=jnp.float32) / denom  # (S, Dh)
            # fold the per-head slice of the output projection in here and
            # accumulate into a contiguous (S, E) slab (no narrow per-head writes)
            attn = attn + jnp.dot(o_h, w_out[sl, :], preferred_element_type=jnp.float32)
        attn = attn + b_out_ref[l]

        # --- residual + LayerNorm1 (residual add fused into the norm input) ---
        x1 = layer_norm(x + attn, ln1_g_ref[l], ln1_b_ref[l])

        # --- feed forward (relu) ---
        hdn = jnp.dot(x1, w_fc1_ref[l], preferred_element_type=jnp.float32) + b_fc1_ref[l]
        hdn = jnp.maximum(hdn, 0.0)
        ffn = jnp.dot(hdn, w_fc2_ref[l], preferred_element_type=jnp.float32) + b_fc2_ref[l]

        # --- residual + LayerNorm2 ---
        x = layer_norm(x1 + ffn, ln2_g_ref[l], ln2_b_ref[l])

    # --- linear decode into a lane-dense, 128-wide zero-padded logits slab ---
    logits = jnp.dot(x, out_w_ref[...], preferred_element_type=jnp.float32) + out_b_ref[...]
    o_ref[0] = logits.astype(o_ref.dtype)


# ----------------------------------------------------------------------------
# Forward wrapper (gathers in XLA, everything else in the fused Pallas kernel)
# ----------------------------------------------------------------------------
def primitive_model_forward(params, src, init_embedding=None, *,
                            num_heads, num_layers, num_val):
    # TODO(synk): embedding lookups are gathers; kept as jnp.take outside the kernel.
    val_e = jnp.take(params['val_embed'], src['val'], axis=0).astype(jnp.float32)
    coord_e = jnp.take(params['coord_embed'], src['coord'], axis=0).astype(jnp.float32)
    pos_e = jnp.take(params['pos_embed'], src['pos'], axis=0).astype(jnp.float32)
    B, S, E = val_e.shape

    if init_embedding is None:
        init_e = jnp.zeros((B, 1, E), jnp.float32)
    else:
        init_e = init_embedding.astype(jnp.float32).reshape(B, 1, E)

    out_w = params['out_w']           # (E, NP) with NP a multiple of 128, zero-padded
    out_b = params['out_b']           # (1, NP)
    NP = out_w.shape[-1]
    stacked = [params[k] for k in _STACKED_KEYS]

    kernel = functools.partial(_fused_primitive_kernel,
                               num_layers=num_layers, num_heads=num_heads, eps=1e-5)

    act_spec = pl.BlockSpec((1, S, E), lambda b: (b, 0, 0))
    init_spec = pl.BlockSpec((1, 1, E), lambda b: (b, 0, 0))
    # weights: same block every grid step (stay resident across the B-loop / per core)
    weight_specs = [pl.BlockSpec(w.shape, lambda b, n=w.ndim: (0,) * n) for w in stacked]
    head_specs = [pl.BlockSpec((E, NP), lambda b: (0, 0)),
                  pl.BlockSpec((1, NP), lambda b: (0, 0))]

    logits = pl.pallas_call(
        kernel,
        out_shape=jax.ShapeDtypeStruct((B, S, NP), jnp.float32),
        grid=(B,),
        in_specs=[act_spec, act_spec, act_spec, init_spec] + weight_specs + head_specs,
        out_specs=pl.BlockSpec((1, S, NP), lambda b: (b, 0, 0)),
        compiler_params=pltpu.CompilerParams(dimension_semantics=("parallel",)),
    )(val_e, coord_e, pos_e, init_e, *stacked, out_w, out_b)

    return logits[:, :, :num_val]


# ----------------------------------------------------------------------------
# Deterministic parameter init (stacked per-layer weights, padded output head)
# ----------------------------------------------------------------------------
def init_params(key, *, embed_dim, fc_size, num_layers,
                num_val, num_coord, num_pos, pad_idx):
    keys = iter(jax.random.split(key, 64))

    def nrm(shape, s=0.05):
        return (s * jax.random.normal(next(keys), shape)).astype(jnp.float32)

    E, F, L = embed_dim, fc_size, num_layers
    p = {}
    # embedding tables (padding_idx row zeroed, like nn.Embedding(padding_idx=...))
    p['val_embed'] = nrm((num_val, E)).at[pad_idx].set(0.0)
    p['coord_embed'] = nrm((num_coord, E)).at[pad_idx].set(0.0)
    p['pos_embed'] = nrm((num_pos, E)).at[pad_idx].set(0.0)

    # output head, zero-padded to a lane-dense width (multiple of 128)
    NP = max(128, ((num_val + 127) // 128) * 128)
    p['out_w'] = jnp.zeros((E, NP), jnp.float32).at[:, :num_val].set(nrm((E, num_val)))
    p['out_b'] = jnp.zeros((1, NP), jnp.float32)

    # transformer layers, stacked along a leading layer axis
    p['w_in'] = nrm((L, E, 3 * E))
    p['b_in'] = jnp.zeros((L, 1, 3 * E), jnp.float32)
    p['w_out'] = nrm((L, E, E))
    p['b_out'] = jnp.zeros((L, 1, E), jnp.float32)
    p['ln1_g'] = jnp.ones((L, 1, E), jnp.float32)
    p['ln1_b'] = jnp.zeros((L, 1, E), jnp.float32)
    p['w_fc1'] = nrm((L, E, F))
    p['b_fc1'] = jnp.zeros((L, 1, F), jnp.float32)
    p['w_fc2'] = nrm((L, F, E))
    p['b_fc2'] = jnp.zeros((L, 1, E), jnp.float32)
    p['ln2_g'] = jnp.ones((L, 1, E), jnp.float32)
    p['ln2_b'] = jnp.zeros((L, 1, E), jnp.float32)
    return p


# ----------------------------------------------------------------------------
# Main
# ----------------------------------------------------------------------------
if __name__ == "__main__":
    # synthetic stand-ins for img2cad.dataset constants
    PAD = 0
    NUM_SPECIAL_TOKENS = 3            # len(dataset.Token)
    COORD_MAP_SIZES = (2, 2)          # sizes of dataset.COORD_TOKEN_MAP values
    INCLUDE_CONSTRUCTION = False

    num_bins = 8
    max_entities = 8
    embed_dim = 32
    fc_size = 64
    num_heads = 4
    num_layers = 2
    B, S = 2, 8

    num_val = NUM_SPECIAL_TOKENS + num_bins + (2 if INCLUDE_CONSTRUCTION else 0)
    num_coord = 2 + sum(COORD_MAP_SIZES)
    num_pos = 3 + max_entities

    key = jax.random.PRNGKey(0)
    kp, kv, kc, kpos, kinit = jax.random.split(key, 5)
    params = init_params(kp, embed_dim=embed_dim, fc_size=fc_size,
                         num_layers=num_layers, num_val=num_val,
                         num_coord=num_coord, num_pos=num_pos, pad_idx=PAD)

    src = {
        'val': jax.random.randint(kv, (B, S), 0, num_val, dtype=jnp.int32),
        'coord': jax.random.randint(kc, (B, S), 0, num_coord, dtype=jnp.int32),
        'pos': jax.random.randint(kpos, (B, S), 0, num_pos, dtype=jnp.int32),
    }
    # exercises the optional init_embedding path of PrimitiveModel.forward
    init_embedding = jax.random.normal(kinit, (B, embed_dim), jnp.float32)

    fwd = jax.jit(functools.partial(primitive_model_forward,
                                    num_heads=num_heads, num_layers=num_layers,
                                    num_val=num_val))
    out = fwd(params, src, init_embedding)
    jax.block_until_ready(out)
    assert out.shape == (B, S, num_val), out.shape
    assert out.dtype == jnp.float32
    print("KERNEL_OK")
</pallas_src>

<mosaic_0001>
module attributes {stable_mosaic.version = 11 : i64} {
  func.func @_fused_primitive_kernel(%arg0: i32, %arg1: memref<1x8x32xf32, #tpu.memory_space<vmem>>, %arg2: memref<1x8x32xf32, #tpu.memory_space<vmem>>, %arg3: memref<1x8x32xf32, #tpu.memory_space<vmem>>, %arg4: memref<1x1x32xf32, #tpu.memory_space<vmem>>, %arg5: memref<2x32x96xf32, #tpu.memory_space<vmem>>, %arg6: memref<2x1x96xf32, #tpu.memory_space<vmem>>, %arg7: memref<2x32x32xf32, #tpu.memory_space<vmem>>, %arg8: memref<2x1x32xf32, #tpu.memory_space<vmem>>, %arg9: memref<2x1x32xf32, #tpu.memory_space<vmem>>, %arg10: memref<2x1x32xf32, #tpu.memory_space<vmem>>, %arg11: memref<2x32x64xf32, #tpu.memory_space<vmem>>, %arg12: memref<2x1x64xf32, #tpu.memory_space<vmem>>, %arg13: memref<2x64x32xf32, #tpu.memory_space<vmem>>, %arg14: memref<2x1x32xf32, #tpu.memory_space<vmem>>, %arg15: memref<2x1x32xf32, #tpu.memory_space<vmem>>, %arg16: memref<2x1x32xf32, #tpu.memory_space<vmem>>, %arg17: memref<32x128xf32, #tpu.memory_space<vmem>>, %arg18: memref<1x128xf32, #tpu.memory_space<vmem>>, %arg19: memref<1x8x128xf32, #tpu.memory_space<vmem>>) attributes {dimension_semantics = [#tpu.dimension_semantics<parallel>], iteration_bounds = array<i64: 2>, scalar_prefetch = 0 : i64, scratch_operands = 0 : i64, tpu.core_type = #tpu.core_type<tc>, window_params = [{transform_indices = @transform_0, window_bounds = array<i64: 1, 8, 32>}, {transform_indices = @transform_1, window_bounds = array<i64: 1, 8, 32>}, {transform_indices = @transform_2, window_bounds = array<i64: 1, 8, 32>}, {transform_indices = @transform_3, window_bounds = array<i64: 1, 1, 32>}, {pipeline_mode = #tpu.pipeline_mode<synchronous>, transform_indices = @transform_4, window_bounds = array<i64: 2, 32, 96>}, {pipeline_mode = #tpu.pipeline_mode<synchronous>, transform_indices = @transform_5, window_bounds = array<i64: 2, 1, 96>}, {pipeline_mode = #tpu.pipeline_mode<synchronous>, transform_indices = @transform_6, window_bounds = array<i64: 2, 32, 32>}, {pipeline_mode = #tpu.pipeline_mode<synchronous>, transform_indices = @transform_7, window_bounds = array<i64: 2, 1, 32>}, {pipeline_mode = #tpu.pipeline_mode<synchronous>, transform_indices = @transform_8, window_bounds = array<i64: 2, 1, 32>}, {pipeline_mode = #tpu.pipeline_mode<synchronous>, transform_indices = @transform_9, window_bounds = array<i64: 2, 1, 32>}, {pipeline_mode = #tpu.pipeline_mode<synchronous>, transform_indices = @transform_10, window_bounds = array<i64: 2, 32, 64>}, {pipeline_mode = #tpu.pipeline_mode<synchronous>, transform_indices = @transform_11, window_bounds = array<i64: 2, 1, 64>}, {pipeline_mode = #tpu.pipeline_mode<synchronous>, transform_indices = @transform_12, window_bounds = array<i64: 2, 64, 32>}, {pipeline_mode = #tpu.pipeline_mode<synchronous>, transform_indices = @transform_13, window_bounds = array<i64: 2, 1, 32>}, {pipeline_mode = #tpu.pipeline_mode<synchronous>, transform_indices = @transform_14, window_bounds = array<i64: 2, 1, 32>}, {pipeline_mode = #tpu.pipeline_mode<synchronous>, transform_indices = @transform_15, window_bounds = array<i64: 2, 1, 32>}, {pipeline_mode = #tpu.pipeline_mode<synchronous>, transform_indices = @transform_16, window_bounds = array<i64: 32, 128>}, {pipeline_mode = #tpu.pipeline_mode<synchronous>, transform_indices = @transform_17, window_bounds = array<i64: 1, 128>}, {transform_indices = @transform_18, window_bounds = array<i64: 1, 8, 128>}]} {
    %c0 = arith.constant 0 : index
    %c0_0 = arith.constant 0 : index
    %c0_1 = arith.constant 0 : index
    %0 = vector.load %arg1[%c0, %c0_0, %c0_1] : memref<1x8x32xf32, #tpu.memory_space<vmem>>, vector<1x8x32xf32>
    %1 = vector.shape_cast %0 : vector<1x8x32xf32> to vector<8x32xf32>
    %c0_2 = arith.constant 0 : index
    %c0_3 = arith.constant 0 : index
    %c0_4 = arith.constant 0 : index
    %2 = vector.load %arg2[%c0_2, %c0_3, %c0_4] : memref<1x8x32xf32, #tpu.memory_space<vmem>>, vector<1x8x32xf32>
    %3 = vector.shape_cast %2 : vector<1x8x32xf32> to vector<8x32xf32>
    %4 = arith.addf %1, %3 : vector<8x32xf32>
    %c0_5 = arith.constant 0 : index
    %c0_6 = arith.constant 0 : index
    %c0_7 = arith.constant 0 : index
    %5 = vector.load %arg3[%c0_5, %c0_6, %c0_7] : memref<1x8x32xf32, #tpu.memory_space<vmem>>, vector<1x8x32xf32>
    %6 = vector.shape_cast %5 : vector<1x8x32xf32> to vector<8x32xf32>
    %7 = arith.addf %4, %6 : vector<8x32xf32>
    %8 = tpu.iota {dimensions = array<i32: 0>} : vector<8x1xi32>
    %c0_i32 = arith.constant 0 : i32
    %9 = vector.broadcast %c0_i32 : i32 to vector<8x1xi32>
    %10 = arith.cmpi eq, %8, %9 : vector<8x1xi32>
    %cst = arith.constant 1.000000e+00 : f32
    %cst_8 = arith.constant 0.000000e+00 : f32
    %11 = vector.broadcast %cst : f32 to vector<8x1xf32>
    %12 = vector.broadcast %cst_8 : f32 to vector<8x1xf32>
    %13 = arith.select %10, %11, %12 : vector<8x1xi1>, vector<8x1xf32>
    %c0_9 = arith.constant 0 : index
    %c0_10 = arith.constant 0 : index
    %c0_11 = arith.constant 0 : index
    %14 = vector.load %arg4[%c0_9, %c0_10, %c0_11] : memref<1x1x32xf32, #tpu.memory_space<vmem>>, vector<1x1x32xf32>
    %15 = vector.shape_cast %14 : vector<1x1x32xf32> to vector<1x32xf32>
    %16 = vector.broadcast %13 : vector<8x1xf32> to vector<8x32xf32>
    %17 = vector.broadcast %15 : vector<1x32xf32> to vector<8x32xf32>
    %18 = arith.mulf %16, %17 : vector<8x32xf32>
    %19 = arith.addf %7, %18 : vector<8x32xf32>
    %20 = tpu.iota {dimensions = array<i32: 0>} : vector<8x8xi32>
    %21 = tpu.iota {dimensions = array<i32: 1>} : vector<8x8xi32>
    %22 = arith.cmpi sgt, %21, %20 : vector<8x8xi32>
    %cst_12 = arith.constant -1.000000e+30 : f32
    %cst_13 = arith.constant 0.000000e+00 : f32
    %23 = vector.broadcast %cst_12 : f32 to vector<8x8xf32>
    %24 = vector.broadcast %cst_13 : f32 to vector<8x8xf32>
    %25 = arith.select %22, %23, %24 : vector<8x8xi1>, vector<8x8xf32>
    %c0_14 = arith.constant 0 : index
    %c0_15 = arith.constant 0 : index
    %c0_16 = arith.constant 0 : index
    %26 = vector.load %arg5[%c0_14, %c0_15, %c0_16] : memref<2x32x96xf32, #tpu.memory_space<vmem>>, vector<1x32x96xf32>
    %27 = vector.shape_cast %26 : vector<1x32x96xf32> to vector<32x96xf32>
    %cst_17 = arith.constant dense<0.000000e+00> : vector<8x96xf32>
    %28 = tpu.matmul %19, %27, %cst_17 {dimension_numbers = #tpu.dot_dimension_numbers<[1], [0], [0], [1], [0, 0, 1, 1], [], []>} : vector<8x32xf32>, vector<32x96xf32>, vector<8x96xf32> -> vector<8x96xf32>
    %c0_18 = arith.constant 0 : index
    %c0_19 = arith.constant 0 : index
    %c0_20 = arith.constant 0 : index
    %29 = vector.load %arg6[%c0_18, %c0_19, %c0_20] : memref<2x1x96xf32, #tpu.memory_space<vmem>>, vector<1x1x96xf32>
    %30 = vector.shape_cast %29 : vector<1x1x96xf32> to vector<1x96xf32>
    %31 = vector.broadcast %30 : vector<1x96xf32> to vector<8x96xf32>
    %32 = arith.addf %28, %31 : vector<8x96xf32>
    %33 = vector.extract_strided_slice %32 {offsets = [0, 0], sizes = [8, 32], strides = [1, 1]} : vector<8x96xf32> to vector<8x32xf32>
    %cst_21 = arith.constant 0.353553385 : f32
    %34 = vector.broadcast %cst_21 : f32 to vector<8x32xf32>
    %35 = arith.mulf %33, %34 : vector<8x32xf32>
    %36 = vector.extract_strided_slice %32 {offsets = [0, 32], sizes = [8, 32], strides = [1, 1]} : vector<8x96xf32> to vector<8x32xf32>
    %37 = vector.extract_strided_slice %32 {offsets = [0, 64], sizes = [8, 32], strides = [1, 1]} : vector<8x96xf32> to vector<8x32xf32>
    %c0_22 = arith.constant 0 : index
    %c0_23 = arith.constant 0 : index
    %c0_24 = arith.constant 0 : index
    %38 = vector.load %arg7[%c0_22, %c0_23, %c0_24] : memref<2x32x32xf32, #tpu.memory_space<vmem>>, vector<1x32x32xf32>
    %39 = vector.shape_cast %38 : vector<1x32x32xf32> to vector<32x32xf32>
    %cst_25 = arith.constant 0.000000e+00 : f32
    %40 = vector.broadcast %cst_25 : f32 to vector<8x32xf32>
    %41 = vector.extract_strided_slice %35 {offsets = [0, 0], sizes = [8, 8], strides = [1, 1]} : vector<8x32xf32> to vector<8x8xf32>
    %42 = vector.extract_strided_slice %36 {offsets = [0, 0], sizes = [8, 8], strides = [1, 1]} : vector<8x32xf32> to vector<8x8xf32>
    %43 = vector.extract_strided_slice %37 {offsets = [0, 0], sizes = [8, 8], strides = [1, 1]} : vector<8x32xf32> to vector<8x8xf32>
    %cst_26 = arith.constant dense<0.000000e+00> : vector<8x8xf32>
    %44 = tpu.matmul %41, %42, %cst_26 {dimension_numbers = #tpu.dot_dimension_numbers<[1], [1], [0], [0], [0, 0, 1, 0], [], []>} : vector<8x8xf32>, vector<8x8xf32>, vector<8x8xf32> -> vector<8x8xf32>
    %45 = arith.addf %44, %25 : vector<8x8xf32>
    %cst_27 = arith.constant dense<0xFF800000> : vector<8xf32>
    %46 = vector.multi_reduction <maximumf>, %45, %cst_27 [1] : vector<8x8xf32> to vector<8xf32>
    %47 = vector.shape_cast %46 : vector<8xf32> to vector<8x1xf32>
    %48 = vector.broadcast %47 : vector<8x1xf32> to vector<8x8xf32>
    %49 = arith.subf %45, %48 : vector<8x8xf32>
    %50 = math.exp %49 : vector<8x8xf32>
    %cst_28 = arith.constant dense<0.000000e+00> : vector<8xf32>
    %51 = vector.multi_reduction <add>, %50, %cst_28 [1] : vector<8x8xf32> to vector<8xf32>
    %52 = vector.shape_cast %51 : vector<8xf32> to vector<8x1xf32>
    %cst_29 = arith.constant dense<0.000000e+00> : vector<8x8xf32>
    %53 = tpu.matmul %50, %43, %cst_29 {dimension_numbers = #tpu.dot_dimension_numbers<[1], [0], [0], [1], [0, 0, 1, 1], [], []>} : vector<8x8xf32>, vector<8x8xf32>, vector<8x8xf32> -> vector<8x8xf32>
    %54 = vector.broadcast %52 : vector<8x1xf32> to vector<8x8xf32>
    %55 = arith.divf %53, %54 : vector<8x8xf32>
    %56 = vector.extract_strided_slice %39 {offsets = [0, 0], sizes = [8, 32], strides = [1, 1]} : vector<32x32xf32> to vector<8x32xf32>
    %cst_30 = arith.constant dense<0.000000e+00> : vector<8x32xf32>
    %57 = tpu.matmul %55, %56, %cst_30 {dimension_numbers = #tpu.dot_dimension_numbers<[1], [0], [0], [1], [0, 0, 1, 1], [], []>} : vector<8x8xf32>, vector<8x32xf32>, vector<8x32xf32> -> vector<8x32xf32>
    %58 = arith.addf %40, %57 : vector<8x32xf32>
    %59 = vector.extract_strided_slice %35 {offsets = [0, 8], sizes = [8, 8], strides = [1, 1]} : vector<8x32xf32> to vector<8x8xf32>
    %60 = vector.extract_strided_slice %36 {offsets = [0, 8], sizes = [8, 8], strides = [1, 1]} : vector<8x32xf32> to vector<8x8xf32>
    %61 = vector.extract_strided_slice %37 {offsets = [0, 8], sizes = [8, 8], strides = [1, 1]} : vector<8x32xf32> to vector<8x8xf32>
    %cst_31 = arith.constant dense<0.000000e+00> : vector<8x8xf32>
    %62 = tpu.matmul %59, %60, %cst_31 {dimension_numbers = #tpu.dot_dimension_numbers<[1], [1], [0], [0], [0, 0, 1, 0], [], []>} : vector<8x8xf32>, vector<8x8xf32>, vector<8x8xf32> -> vector<8x8xf32>
    %63 = arith.addf %62, %25 : vector<8x8xf32>
    %cst_32 = arith.constant dense<0xFF800000> : vector<8xf32>
    %64 = vector.multi_reduction <maximumf>, %63, %cst_32 [1] : vector<8x8xf32> to vector<8xf32>
    %65 = vector.shape_cast %64 : vector<8xf32> to vector<8x1xf32>
    %66 = vector.broadcast %65 : vector<8x1xf32> to vector<8x8xf32>
    %67 = arith.subf %63, %66 : vector<8x8xf32>
    %68 = math.exp %67 : vector<8x8xf32>
    %cst_33 = arith.constant dense<0.000000e+00> : vector<8xf32>
    %69 = vector.multi_reduction <add>, %68, %cst_33 [1] : vector<8x8xf32> to vector<8xf32>
    %70 = vector.shape_cast %69 : vector<8xf32> to vector<8x1xf32>
    %cst_34 = arith.constant dense<0.000000e+00> : vector<8x8xf32>
    %71 = tpu.matmul %68, %61, %cst_34 {dimension_numbers = #tpu.dot_dimension_numbers<[1], [0], [0], [1], [0, 0, 1, 1], [], []>} : vector<8x8xf32>, vector<8x8xf32>, vector<8x8xf32> -> vector<8x8xf32>
    %72 = vector.broadcast %70 : vector<8x1xf32> to vector<8x8xf32>
    %73 = arith.divf %71, %72 : vector<8x8xf32>
    %74 = vector.extract_strided_slice %39 {offsets = [8, 0], sizes = [8, 32], strides = [1, 1]} : vector<32x32xf32> to vector<8x32xf32>
    %cst_35 = arith.constant dense<0.000000e+00> : vector<8x32xf32>
    %75 = tpu.matmul %73, %74, %cst_35 {dimension_numbers = #tpu.dot_dimension_numbers<[1], [0], [0], [1], [0, 0, 1, 1], [], []>} : vector<8x8xf32>, vector<8x32xf32>, vector<8x32xf32> -> vector<8x32xf32>
    %76 = arith.addf %58, %75 : vector<8x32xf32>
    %77 = vector.extract_strided_slice %35 {offsets = [0, 16], sizes = [8, 8], strides = [1, 1]} : vector<8x32xf32> to vector<8x8xf32>
    %78 = vector.extract_strided_slice %36 {offsets = [0, 16], sizes = [8, 8], strides = [1, 1]} : vector<8x32xf32> to vector<8x8xf32>
    %79 = vector.extract_strided_slice %37 {offsets = [0, 16], sizes = [8, 8], strides = [1, 1]} : vector<8x32xf32> to vector<8x8xf32>
    %cst_36 = arith.constant dense<0.000000e+00> : vector<8x8xf32>
    %80 = tpu.matmul %77, %78, %cst_36 {dimension_numbers = #tpu.dot_dimension_numbers<[1], [1], [0], [0], [0, 0, 1, 0], [], []>} : vector<8x8xf32>, vector<8x8xf32>, vector<8x8xf32> -> vector<8x8xf32>
    %81 = arith.addf %80, %25 : vector<8x8xf32>
    %cst_37 = arith.constant dense<0xFF800000> : vector<8xf32>
    %82 = vector.multi_reduction <maximumf>, %81, %cst_37 [1] : vector<8x8xf32> to vector<8xf32>
    %83 = vector.shape_cast %82 : vector<8xf32> to vector<8x1xf32>
    %84 = vector.broadcast %83 : vector<8x1xf32> to vector<8x8xf32>
    %85 = arith.subf %81, %84 : vector<8x8xf32>
    %86 = math.exp %85 : vector<8x8xf32>
    %cst_38 = arith.constant dense<0.000000e+00> : vector<8xf32>
    %87 = vector.multi_reduction <add>, %86, %cst_38 [1] : vector<8x8xf32> to vector<8xf32>
    %88 = vector.shape_cast %87 : vector<8xf32> to vector<8x1xf32>
    %cst_39 = arith.constant dense<0.000000e+00> : vector<8x8xf32>
    %89 = tpu.matmul %86, %79, %cst_39 {dimension_numbers = #tpu.dot_dimension_numbers<[1], [0], [0], [1], [0, 0, 1, 1], [], []>} : vector<8x8xf32>, vector<8x8xf32>, vector<8x8xf32> -> vector<8x8xf32>
    %90 = vector.broadcast %88 : vector<8x1xf32> to vector<8x8xf32>
    %91 = arith.divf %89, %90 : vector<8x8xf32>
    %92 = vector.extract_strided_slice %39 {offsets = [16, 0], sizes = [8, 32], strides = [1, 1]} : vector<32x32xf32> to vector<8x32xf32>
    %cst_40 = arith.constant dense<0.000000e+00> : vector<8x32xf32>
    %93 = tpu.matmul %91, %92, %cst_40 {dimension_numbers = #tpu.dot_dimension_numbers<[1], [0], [0], [1], [0, 0, 1, 1], [], []>} : vector<8x8xf32>, vector<8x32xf32>, vector<8x32xf32> -> vector<8x32xf32>
    %94 = arith.addf %76, %93 : vector<8x32xf32>
    %95 = vector.extract_strided_slice %35 {offsets = [0, 24], sizes = [8, 8], strides = [1, 1]} : vector<8x32xf32> to vector<8x8xf32>
    %96 = vector.extract_strided_slice %36 {offsets = [0, 24], sizes = [8, 8], strides = [1, 1]} : vector<8x32xf32> to vector<8x8xf32>
    %97 = vector.extract_strided_slice %37 {offsets = [0, 24], sizes = [8, 8], strides = [1, 1]} : vector<8x32xf32> to vector<8x8xf32>
    %cst_41 = arith.constant dense<0.000000e+00> : vector<8x8xf32>
    %98 = tpu.matmul %95, %96, %cst_41 {dimension_numbers = #tpu.dot_dimension_numbers<[1], [1], [0], [0], [0, 0, 1, 0], [], []>} : vector<8x8xf32>, vector<8x8xf32>, vector<8x8xf32> -> vector<8x8xf32>
    %99 = arith.addf %98, %25 : vector<8x8xf32>
    %cst_42 = arith.constant dense<0xFF800000> : vector<8xf32>
    %100 = vector.multi_reduction <maximumf>, %99, %cst_42 [1] : vector<8x8xf32> to vector<8xf32>
    %101 = vector.shape_cast %100 : vector<8xf32> to vector<8x1xf32>
    %102 = vector.broadcast %101 : vector<8x1xf32> to vector<8x8xf32>
    %103 = arith.subf %99, %102 : vector<8x8xf32>
    %104 = math.exp %103 : vector<8x8xf32>
    %cst_43 = arith.constant dense<0.000000e+00> : vector<8xf32>
    %105 = vector.multi_reduction <add>, %104, %cst_43 [1] : vector<8x8xf32> to vector<8xf32>
    %106 = vector.shape_cast %105 : vector<8xf32> to vector<8x1xf32>
    %cst_44 = arith.constant dense<0.000000e+00> : vector<8x8xf32>
    %107 = tpu.matmul %104, %97, %cst_44 {dimension_numbers = #tpu.dot_dimension_numbers<[1], [0], [0], [1], [0, 0, 1, 1], [], []>} : vector<8x8xf32>, vector<8x8xf32>, vector<8x8xf32> -> vector<8x8xf32>
    %108 = vector.broadcast %106 : vector<8x1xf32> to vector<8x8xf32>
    %109 = arith.divf %107, %108 : vector<8x8xf32>
    %110 = vector.extract_strided_slice %39 {offsets = [24, 0], sizes = [8, 32], strides = [1, 1]} : vector<32x32xf32> to vector<8x32xf32>
    %cst_45 = arith.constant dense<0.000000e+00> : vector<8x32xf32>
    %111 = tpu.matmul %109, %110, %cst_45 {dimension_numbers = #tpu.dot_dimension_numbers<[1], [0], [0], [1], [0, 0, 1, 1], [], []>} : vector<8x8xf32>, vector<8x32xf32>, vector<8x32xf32> -> vector<8x32xf32>
    %112 = arith.addf %94, %111 : vector<8x32xf32>
    %c0_46 = arith.constant 0 : index
    %c0_47 = arith.constant 0 : index
    %c0_48 = arith.constant 0 : index
    %113 = vector.load %arg8[%c0_46, %c0_47, %c0_48] : memref<2x1x32xf32, #tpu.memory_space<vmem>>, vector<1x1x32xf32>
    %114 = vector.shape_cast %113 : vector<1x1x32xf32> to vector<1x32xf32>
    %115 = vector.broadcast %114 : vector<1x32xf32> to vector<8x32xf32>
    %116 = arith.addf %112, %115 : vector<8x32xf32>
    %117 = arith.addf %19, %116 : vector<8x32xf32>
    %c0_49 = arith.constant 0 : index
    %c0_50 = arith.constant 0 : index
    %c0_51 = arith.constant 0 : index
    %118 = vector.load %arg9[%c0_49, %c0_50, %c0_51] : memref<2x1x32xf32, #tpu.memory_space<vmem>>, vector<1x1x32xf32>
    %119 = vector.shape_cast %118 : vector<1x1x32xf32> to vector<1x32xf32>
    %c0_52 = arith.constant 0 : index
    %c0_53 = arith.constant 0 : index
    %c0_54 = arith.constant 0 : index
    %120 = vector.load %arg10[%c0_52, %c0_53, %c0_54] : memref<2x1x32xf32, #tpu.memory_space<vmem>>, vector<1x1x32xf32>
    %121 = vector.shape_cast %120 : vector<1x1x32xf32> to vector<1x32xf32>
    %cst_55 = arith.constant dense<0.000000e+00> : vector<8xf32>
    %122 = vector.multi_reduction <add>, %117, %cst_55 [1] : vector<8x32xf32> to vector<8xf32>
    %123 = vector.shape_cast %122 : vector<8xf32> to vector<8x1xf32>
    %cst_56 = arith.constant 3.200000e+01 : f32
    %124 = vector.broadcast %cst_56 : f32 to vector<8x1xf32>
    %125 = arith.divf %123, %124 : vector<8x1xf32>
    %126 = vector.broadcast %125 : vector<8x1xf32> to vector<8x32xf32>
    %127 = arith.subf %117, %126 : vector<8x32xf32>
    %128 = arith.mulf %127, %127 : vector<8x32xf32>
    %cst_57 = arith.constant dense<0.000000e+00> : vector<8xf32>
    %129 = vector.multi_reduction <add>, %128, %cst_57 [1] : vector<8x32xf32> to vector<8xf32>
    %130 = vector.shape_cast %129 : vector<8xf32> to vector<8x1xf32>
    %cst_58 = arith.constant 3.200000e+01 : f32
    %131 = vector.broadcast %cst_58 : f32 to vector<8x1xf32>
    %132 = arith.divf %130, %131 : vector<8x1xf32>
    %133 = vector.broadcast %125 : vector<8x1xf32> to vector<8x32xf32>
    %134 = arith.subf %117, %133 : vector<8x32xf32>
    %cst_59 = arith.constant 9.99999974E-6 : f32
    %135 = vector.broadcast %cst_59 : f32 to vector<8x1xf32>
    %136 = arith.addf %132, %135 : vector<8x1xf32>
    %137 = math.rsqrt %136 : vector<8x1xf32>
    %138 = vector.broadcast %137 : vector<8x1xf32> to vector<8x32xf32>
    %139 = arith.mulf %134, %138 : vector<8x32xf32>
    %140 = vector.broadcast %119 : vector<1x32xf32> to vector<8x32xf32>
    %141 = arith.mulf %139, %140 : vector<8x32xf32>
    %142 = vector.broadcast %121 : vector<1x32xf32> to vector<8x32xf32>
    %143 = arith.addf %141, %142 : vector<8x32xf32>
    %c0_60 = arith.constant 0 : index
    %c0_61 = arith.constant 0 : index
    %c0_62 = arith.constant 0 : index
    %144 = vector.load %arg11[%c0_60, %c0_61, %c0_62] : memref<2x32x64xf32, #tpu.memory_space<vmem>>, vector<1x32x64xf32>
    %145 = vector.shape_cast %144 : vector<1x32x64xf32> to vector<32x64xf32>
    %cst_63 = arith.constant dense<0.000000e+00> : vector<8x64xf32>
    %146 = tpu.matmul %143, %145, %cst_63 {dimension_numbers = #tpu.dot_dimension_numbers<[1], [0], [0], [1], [0, 0, 1, 1], [], []>} : vector<8x32xf32>, vector<32x64xf32>, vector<8x64xf32> -> vector<8x64xf32>
    %c0_64 = arith.constant 0 : index
    %c0_65 = arith.constant 0 : index
    %c0_66 = arith.constant 0 : index
    %147 = vector.load %arg12[%c0_64, %c0_65, %c0_66] : memref<2x1x64xf32, #tpu.memory_space<vmem>>, vector<1x1x64xf32>
    %148 = vector.shape_cast %147 : vector<1x1x64xf32> to vector<1x64xf32>
    %149 = vector.broadcast %148 : vector<1x64xf32> to vector<8x64xf32>
    %150 = arith.addf %146, %149 : vector<8x64xf32>
    %cst_67 = arith.constant 0.000000e+00 : f32
    %151 = vector.broadcast %cst_67 : f32 to vector<8x64xf32>
    %152 = arith.maximumf %150, %151 : vector<8x64xf32>
    %c0_68 = arith.constant 0 : index
    %c0_69 = arith.constant 0 : index
    %c0_70 = arith.constant 0 : index
    %153 = vector.load %arg13[%c0_68, %c0_69, %c0_70] : memref<2x64x32xf32, #tpu.memory_space<vmem>>, vector<1x64x32xf32>
    %154 = vector.shape_cast %153 : vector<1x64x32xf32> to vector<64x32xf32>
    %cst_71 = arith.constant dense<0.000000e+00> : vector<8x32xf32>
    %155 = tpu.matmul %152, %154, %cst_71 {dimension_numbers = #tpu.dot_dimension_numbers<[1], [0], [0], [1], [0, 0, 1, 1], [], []>} : vector<8x64xf32>, vector<64x32xf32>, vector<8x32xf32> -> vector<8x32xf32>
    %c0_72 = arith.constant 0 : index
    %c0_73 = arith.constant 0 : index
    %c0_74 = arith.constant 0 : index
    %156 = vector.load %arg14[%c0_72, %c0_73, %c0_74] : memref<2x1x32xf32, #tpu.memory_space<vmem>>, vector<1x1x32xf32>
    %157 = vector.shape_cast %156 : vector<1x1x32xf32> to vector<1x32xf32>
    %158 = vector.broadcast %157 : vector<1x32xf32> to vector<8x32xf32>
    %159 = arith.addf %155, %158 : vector<8x32xf32>
    %160 = arith.addf %143, %159 : vector<8x32xf32>
    %c0_75 = arith.constant 0 : index
    %c0_76 = arith.constant 0 : index
    %c0_77 = arith.constant 0 : index
    %161 = vector.load %arg15[%c0_75, %c0_76, %c0_77] : memref<2x1x32xf32, #tpu.memory_space<vmem>>, vector<1x1x32xf32>
    %162 = vector.shape_cast %161 : vector<1x1x32xf32> to vector<1x32xf32>
    %c0_78 = arith.constant 0 : index
    %c0_79 = arith.constant 0 : index
    %c0_80 = arith.constant 0 : index
    %163 = vector.load %arg16[%c0_78, %c0_79, %c0_80] : memref<2x1x32xf32, #tpu.memory_space<vmem>>, vector<1x1x32xf32>
    %164 = vector.shape_cast %163 : vector<1x1x32xf32> to vector<1x32xf32>
    %cst_81 = arith.constant dense<0.000000e+00> : vector<8xf32>
    %165 = vector.multi_reduction <add>, %160, %cst_81 [1] : vector<8x32xf32> to vector<8xf32>
    %166 = vector.shape_cast %165 : vector<8xf32> to vector<8x1xf32>
    %cst_82 = arith.constant 3.200000e+01 : f32
    %167 = vector.broadcast %cst_82 : f32 to vector<8x1xf32>
    %168 = arith.divf %166, %167 : vector<8x1xf32>
    %169 = vector.broadcast %168 : vector<8x1xf32> to vector<8x32xf32>
    %170 = arith.subf %160, %169 : vector<8x32xf32>
    %171 = arith.mulf %170, %170 : vector<8x32xf32>
    %cst_83 = arith.constant dense<0.000000e+00> : vector<8xf32>
    %172 = vector.multi_reduction <add>, %171, %cst_83 [1] : vector<8x32xf32> to vector<8xf32>
    %173 = vector.shape_cast %172 : vector<8xf32> to vector<8x1xf32>
    %cst_84 = arith.constant 3.200000e+01 : f32
    %174 = vector.broadcast %cst_84 : f32 to vector<8x1xf32>
    %175 = arith.divf %173, %174 : vector<8x1xf32>
    %176 = vector.broadcast %168 : vector<8x1xf32> to vector<8x32xf32>
    %177 = arith.subf %160, %176 : vector<8x32xf32>
    %cst_85 = arith.constant 9.99999974E-6 : f32
    %178 = vector.broadcast %cst_85 : f32 to vector<8x1xf32>
    %179 = arith.addf %175, %178 : vector<8x1xf32>
    %180 = math.rsqrt %179 : vector<8x1xf32>
    %181 = vector.broadcast %180 : vector<8x1xf32> to vector<8x32xf32>
    %182 = arith.mulf %177, %181 : vector<8x32xf32>
    %183 = vector.broadcast %162 : vector<1x32xf32> to vector<8x32xf32>
    %184 = arith.mulf %182, %183 : vector<8x32xf32>
    %185 = vector.broadcast %164 : vector<1x32xf32> to vector<8x32xf32>
    %186 = arith.addf %184, %185 : vector<8x32xf32>
    %c1 = arith.constant 1 : index
    %c0_86 = arith.constant 0 : index
    %c0_87 = arith.constant 0 : index
    %187 = vector.load %arg5[%c1, %c0_86, %c0_87] : memref<2x32x96xf32, #tpu.memory_space<vmem>>, vector<1x32x96xf32>
    %188 = vector.shape_cast %187 : vector<1x32x96xf32> to vector<32x96xf32>
    %cst_88 = arith.constant dense<0.000000e+00> : vector<8x96xf32>
    %189 = tpu.matmul %186, %188, %cst_88 {dimension_numbers = #tpu.dot_dimension_numbers<[1], [0], [0], [1], [0, 0, 1, 1], [], []>} : vector<8x32xf32>, vector<32x96xf32>, vector<8x96xf32> -> vector<8x96xf32>
    %c1_89 = arith.constant 1 : index
    %c0_90 = arith.constant 0 : index
    %c0_91 = arith.constant 0 : index
    %190 = vector.load %arg6[%c1_89, %c0_90, %c0_91] : memref<2x1x96xf32, #tpu.memory_space<vmem>>, vector<1x1x96xf32>
    %191 = vector.shape_cast %190 : vector<1x1x96xf32> to vector<1x96xf32>
    %192 = vector.broadcast %191 : vector<1x96xf32> to vector<8x96xf32>
    %193 = arith.addf %189, %192 : vector<8x96xf32>
    %194 = vector.extract_strided_slice %193 {offsets = [0, 0], sizes = [8, 32], strides = [1, 1]} : vector<8x96xf32> to vector<8x32xf32>
    %cst_92 = arith.constant 0.353553385 : f32
    %195 = vector.broadcast %cst_92 : f32 to vector<8x32xf32>
    %196 = arith.mulf %194, %195 : vector<8x32xf32>
    %197 = vector.extract_strided_slice %193 {offsets = [0, 32], sizes = [8, 32], strides = [1, 1]} : vector<8x96xf32> to vector<8x32xf32>
    %198 = vector.extract_strided_slice %193 {offsets = [0, 64], sizes = [8, 32], strides = [1, 1]} : vector<8x96xf32> to vector<8x32xf32>
    %c1_93 = arith.constant 1 : index
    %c0_94 = arith.constant 0 : index
    %c0_95 = arith.constant 0 : index
    %199 = vector.load %arg7[%c1_93, %c0_94, %c0_95] : memref<2x32x32xf32, #tpu.memory_space<vmem>>, vector<1x32x32xf32>
    %200 = vector.shape_cast %199 : vector<1x32x32xf32> to vector<32x32xf32>
    %cst_96 = arith.constant 0.000000e+00 : f32
    %201 = vector.broadcast %cst_96 : f32 to vector<8x32xf32>
    %202 = vector.extract_strided_slice %196 {offsets = [0, 0], sizes = [8, 8], strides = [1, 1]} : vector<8x32xf32> to vector<8x8xf32>
    %203 = vector.extract_strided_slice %197 {offsets = [0, 0], sizes = [8, 8], strides = [1, 1]} : vector<8x32xf32> to vector<8x8xf32>
    %204 = vector.extract_strided_slice %198 {offsets = [0, 0], sizes = [8, 8], strides = [1, 1]} : vector<8x32xf32> to vector<8x8xf32>
    %cst_97 = arith.constant dense<0.000000e+00> : vector<8x8xf32>
    %205 = tpu.matmul %202, %203, %cst_97 {dimension_numbers = #tpu.dot_dimension_numbers<[1], [1], [0], [0], [0, 0, 1, 0], [], []>} : vector<8x8xf32>, vector<8x8xf32>, vector<8x8xf32> -> vector<8x8xf32>
    %206 = arith.addf %205, %25 : vector<8x8xf32>
    %cst_98 = arith.constant dense<0xFF800000> : vector<8xf32>
    %207 = vector.multi_reduction <maximumf>, %206, %cst_98 [1] : vector<8x8xf32> to vector<8xf32>
    %208 = vector.shape_cast %207 : vector<8xf32> to vector<8x1xf32>
    %209 = vector.broadcast %208 : vector<8x1xf32> to vector<8x8xf32>
    %210 = arith.subf %206, %209 : vector<8x8xf32>
    %211 = math.exp %210 : vector<8x8xf32>
    %cst_99 = arith.constant dense<0.000000e+00> : vector<8xf32>
    %212 = vector.multi_reduction <add>, %211, %cst_99 [1] : vector<8x8xf32> to vector<8xf32>
    %213 = vector.shape_cast %212 : vector<8xf32> to vector<8x1xf32>
    %cst_100 = arith.constant dense<0.000000e+00> : vector<8x8xf32>
    %214 = tpu.matmul %211, %204, %cst_100 {dimension_numbers = #tpu.dot_dimension_numbers<[1], [0], [0], [1], [0, 0, 1, 1], [], []>} : vector<8x8xf32>, vector<8x8xf32>, vector<8x8xf32> -> vector<8x8xf32>
    %215 = vector.broadcast %213 : vector<8x1xf32> to vector<8x8xf32>
    %216 = arith.divf %214, %215 : vector<8x8xf32>
    %217 = vector.extract_strided_slice %200 {offsets = [0, 0], sizes = [8, 32], strides = [1, 1]} : vector<32x32xf32> to vector<8x32xf32>
    %cst_101 = arith.constant dense<0.000000e+00> : vector<8x32xf32>
    %218 = tpu.matmul %216, %217, %cst_101 {dimension_numbers = #tpu.dot_dimension_numbers<[1], [0], [0], [1], [0, 0, 1, 1], [], []>} : vector<8x8xf32>, vector<8x32xf32>, vector<8x32xf32> -> vector<8x32xf32>
    %219 = arith.addf %201, %218 : vector<8x32xf32>
    %220 = vector.extract_strided_slice %196 {offsets = [0, 8], sizes = [8, 8], strides = [1, 1]} : vector<8x32xf32> to vector<8x8xf32>
    %221 = vector.extract_strided_slice %197 {offsets = [0, 8], sizes = [8, 8], strides = [1, 1]} : vector<8x32xf32> to vector<8x8xf32>
    %222 = vector.extract_strided_slice %198 {offsets = [0, 8], sizes = [8, 8], strides = [1, 1]} : vector<8x32xf32> to vector<8x8xf32>
    %cst_102 = arith.constant dense<0.000000e+00> : vector<8x8xf32>
    %223 = tpu.matmul %220, %221, %cst_102 {dimension_numbers = #tpu.dot_dimension_numbers<[1], [1], [0], [0], [0, 0, 1, 0], [], []>} : vector<8x8xf32>, vector<8x8xf32>, vector<8x8xf32> -> vector<8x8xf32>
    %224 = arith.addf %223, %25 : vector<8x8xf32>
    %cst_103 = arith.constant dense<0xFF800000> : vector<8xf32>
    %225 = vector.multi_reduction <maximumf>, %224, %cst_103 [1] : vector<8x8xf32> to vector<8xf32>
    %226 = vector.shape_cast %225 : vector<8xf32> to vector<8x1xf32>
    %227 = vector.broadcast %226 : vector<8x1xf32> to vector<8x8xf32>
    %228 = arith.subf %224, %227 : vector<8x8xf32>
    %229 = math.exp %228 : vector<8x8xf32>
    %cst_104 = arith.constant dense<0.000000e+00> : vector<8xf32>
    %230 = vector.multi_reduction <add>, %229, %cst_104 [1] : vector<8x8xf32> to vector<8xf32>
    %231 = vector.shape_cast %230 : vector<8xf32> to vector<8x1xf32>
    %cst_105 = arith.constant dense<0.000000e+00> : vector<8x8xf32>
    %232 = tpu.matmul %229, %222, %cst_105 {dimension_numbers = #tpu.dot_dimension_numbers<[1], [0], [0], [1], [0, 0, 1, 1], [], []>} : vector<8x8xf32>, vector<8x8xf32>, vector<8x8xf32> -> vector<8x8xf32>
    %233 = vector.broadcast %231 : vector<8x1xf32> to vector<8x8xf32>
    %234 = arith.divf %232, %233 : vector<8x8xf32>
    %235 = vector.extract_strided_slice %200 {offsets = [8, 0], sizes = [8, 32], strides = [1, 1]} : vector<32x32xf32> to vector<8x32xf32>
    %cst_106 = arith.constant dense<0.000000e+00> : vector<8x32xf32>
    %236 = tpu.matmul %234, %235, %cst_106 {dimension_numbers = #tpu.dot_dimension_numbers<[1], [0], [0], [1], [0, 0, 1, 1], [], []>} : vector<8x8xf32>, vector<8x32xf32>, vector<8x32xf32> -> vector<8x32xf32>
    %237 = arith.addf %219, %236 : vector<8x32xf32>
    %238 = vector.extract_strided_slice %196 {offsets = [0, 16], sizes = [8, 8], strides = [1, 1]} : vector<8x32xf32> to vector<8x8xf32>
    %239 = vector.extract_strided_slice %197 {offsets = [0, 16], sizes = [8, 8], strides = [1, 1]} : vector<8x32xf32> to vector<8x8xf32>
    %240 = vector.extract_strided_slice %198 {offsets = [0, 16], sizes = [8, 8], strides = [1, 1]} : vector<8x32xf32> to vector<8x8xf32>
    %cst_107 = arith.constant dense<0.000000e+00> : vector<8x8xf32>
    %241 = tpu.matmul %238, %239, %cst_107 {dimension_numbers = #tpu.dot_dimension_numbers<[1], [1], [0], [0], [0, 0, 1, 0], [], []>} : vector<8x8xf32>, vector<8x8xf32>, vector<8x8xf32> -> vector<8x8xf32>
    %242 = arith.addf %241, %25 : vector<8x8xf32>
    %cst_108 = arith.constant dense<0xFF800000> : vector<8xf32>
    %243 = vector.multi_reduction <maximumf>, %242, %cst_108 [1] : vector<8x8xf32> to vector<8xf32>
    %244 = vector.shape_cast %243 : vector<8xf32> to vector<8x1xf32>
    %245 = vector.broadcast %244 : vector<8x1xf32> to vector<8x8xf32>
    %246 = arith.subf %242, %245 : vector<8x8xf32>
    %247 = math.exp %246 : vector<8x8xf32>
    %cst_109 = arith.constant dense<0.000000e+00> : vector<8xf32>
    %248 = vector.multi_reduction <add>, %247, %cst_109 [1] : vector<8x8xf32> to vector<8xf32>
    %249 = vector.shape_cast %248 : vector<8xf32> to vector<8x1xf32>
    %cst_110 = arith.constant dense<0.000000e+00> : vector<8x8xf32>
    %250 = tpu.matmul %247, %240, %cst_110 {dimension_numbers = #tpu.dot_dimension_numbers<[1], [0], [0], [1], [0, 0, 1, 1], [], []>} : vector<8x8xf32>, vector<8x8xf32>, vector<8x8xf32> -> vector<8x8xf32>
    %251 = vector.broadcast %249 : vector<8x1xf32> to vector<8x8xf32>
    %252 = arith.divf %250, %251 : vector<8x8xf32>
    %253 = vector.extract_strided_slice %200 {offsets = [16, 0], sizes = [8, 32], strides = [1, 1]} : vector<32x32xf32> to vector<8x32xf32>
    %cst_111 = arith.constant dense<0.000000e+00> : vector<8x32xf32>
    %254 = tpu.matmul %252, %253, %cst_111 {dimension_numbers = #tpu.dot_dimension_numbers<[1], [0], [0], [1], [0, 0, 1, 1], [], []>} : vector<8x8xf32>, vector<8x32xf32>, vector<8x32xf32> -> vector<8x32xf32>
    %255 = arith.addf %237, %254 : vector<8x32xf32>
    %256 = vector.extract_strided_slice %196 {offsets = [0, 24], sizes = [8, 8], strides = [1, 1]} : vector<8x32xf32> to vector<8x8xf32>
    %257 = vector.extract_strided_slice %197 {offsets = [0, 24], sizes = [8, 8], strides = [1, 1]} : vector<8x32xf32> to vector<8x8xf32>
    %258 = vector.extract_strided_slice %198 {offsets = [0, 24], sizes = [8, 8], strides = [1, 1]} : vector<8x32xf32> to vector<8x8xf32>
    %cst_112 = arith.constant dense<0.000000e+00> : vector<8x8xf32>
    %259 = tpu.matmul %256, %257, %cst_112 {dimension_numbers = #tpu.dot_dimension_numbers<[1], [1], [0], [0], [0, 0, 1, 0], [], []>} : vector<8x8xf32>, vector<8x8xf32>, vector<8x8xf32> -> vector<8x8xf32>
    %260 = arith.addf %259, %25 : vector<8x8xf32>
    %cst_113 = arith.constant dense<0xFF800000> : vector<8xf32>
    %261 = vector.multi_reduction <maximumf>, %260, %cst_113 [1] : vector<8x8xf32> to vector<8xf32>
    %262 = vector.shape_cast %261 : vector<8xf32> to vector<8x1xf32>
    %263 = vector.broadcast %262 : vector<8x1xf32> to vector<8x8xf32>
    %264 = arith.subf %260, %263 : vector<8x8xf32>
    %265 = math.exp %264 : vector<8x8xf32>
    %cst_114 = arith.constant dense<0.000000e+00> : vector<8xf32>
    %266 = vector.multi_reduction <add>, %265, %cst_114 [1] : vector<8x8xf32> to vector<8xf32>
    %267 = vector.shape_cast %266 : vector<8xf32> to vector<8x1xf32>
    %cst_115 = arith.constant dense<0.000000e+00> : vector<8x8xf32>
    %268 = tpu.matmul %265, %258, %cst_115 {dimension_numbers = #tpu.dot_dimension_numbers<[1], [0], [0], [1], [0, 0, 1, 1], [], []>} : vector<8x8xf32>, vector<8x8xf32>, vector<8x8xf32> -> vector<8x8xf32>
    %269 = vector.broadcast %267 : vector<8x1xf32> to vector<8x8xf32>
    %270 = arith.divf %268, %269 : vector<8x8xf32>
    %271 = vector.extract_strided_slice %200 {offsets = [24, 0], sizes = [8, 32], strides = [1, 1]} : vector<32x32xf32> to vector<8x32xf32>
    %cst_116 = arith.constant dense<0.000000e+00> : vector<8x32xf32>
    %272 = tpu.matmul %270, %271, %cst_116 {dimension_numbers = #tpu.dot_dimension_numbers<[1], [0], [0], [1], [0, 0, 1, 1], [], []>} : vector<8x8xf32>, vector<8x32xf32>, vector<8x32xf32> -> vector<8x32xf32>
    %273 = arith.addf %255, %272 : vector<8x32xf32>
    %c1_117 = arith.constant 1 : index
    %c0_118 = arith.constant 0 : index
    %c0_119 = arith.constant 0 : index
    %274 = vector.load %arg8[%c1_117, %c0_118, %c0_119] : memref<2x1x32xf32, #tpu.memory_space<vmem>>, vector<1x1x32xf32>
    %275 = vector.shape_cast %274 : vector<1x1x32xf32> to vector<1x32xf32>
    %276 = vector.broadcast %275 : vector<1x32xf32> to vector<8x32xf32>
    %277 = arith.addf %273, %276 : vector<8x32xf32>
    %278 = arith.addf %186, %277 : vector<8x32xf32>
    %c1_120 = arith.constant 1 : index
    %c0_121 = arith.constant 0 : index
    %c0_122 = arith.constant 0 : index
    %279 = vector.load %arg9[%c1_120, %c0_121, %c0_122] : memref<2x1x32xf32, #tpu.memory_space<vmem>>, vector<1x1x32xf32>
    %280 = vector.shape_cast %279 : vector<1x1x32xf32> to vector<1x32xf32>
    %c1_123 = arith.constant 1 : index
    %c0_124 = arith.constant 0 : index
    %c0_125 = arith.constant 0 : index
    %281 = vector.load %arg10[%c1_123, %c0_124, %c0_125] : memref<2x1x32xf32, #tpu.memory_space<vmem>>, vector<1x1x32xf32>
    %282 = vector.shape_cast %281 : vector<1x1x32xf32> to vector<1x32xf32>
    %cst_126 = arith.constant dense<0.000000e+00> : vector<8xf32>
    %283 = vector.multi_reduction <add>, %278, %cst_126 [1] : vector<8x32xf32> to vector<8xf32>
    %284 = vector.shape_cast %283 : vector<8xf32> to vector<8x1xf32>
    %cst_127 = arith.constant 3.200000e+01 : f32
    %285 = vector.broadcast %cst_127 : f32 to vector<8x1xf32>
    %286 = arith.divf %284, %285 : vector<8x1xf32>
    %287 = vector.broadcast %286 : vector<8x1xf32> to vector<8x32xf32>
    %288 = arith.subf %278, %287 : vector<8x32xf32>
    %289 = arith.mulf %288, %288 : vector<8x32xf32>
    %cst_128 = arith.constant dense<0.000000e+00> : vector<8xf32>
    %290 = vector.multi_reduction <add>, %289, %cst_128 [1] : vector<8x32xf32> to vector<8xf32>
    %291 = vector.shape_cast %290 : vector<8xf32> to vector<8x1xf32>
    %cst_129 = arith.constant 3.200000e+01 : f32
    %292 = vector.broadcast %cst_129 : f32 to vector<8x1xf32>
    %293 = arith.divf %291, %292 : vector<8x1xf32>
    %294 = vector.broadcast %286 : vector<8x1xf32> to vector<8x32xf32>
    %295 = arith.subf %278, %294 : vector<8x32xf32>
    %cst_130 = arith.constant 9.99999974E-6 : f32
    %296 = vector.broadcast %cst_130 : f32 to vector<8x1xf32>
    %297 = arith.addf %293, %296 : vector<8x1xf32>
    %298 = math.rsqrt %297 : vector<8x1xf32>
    %299 = vector.broadcast %298 : vector<8x1xf32> to vector<8x32xf32>
    %300 = arith.mulf %295, %299 : vector<8x32xf32>
    %301 = vector.broadcast %280 : vector<1x32xf32> to vector<8x32xf32>
    %302 = arith.mulf %300, %301 : vector<8x32xf32>
    %303 = vector.broadcast %282 : vector<1x32xf32> to vector<8x32xf32>
    %304 = arith.addf %302, %303 : vector<8x32xf32>
    %c1_131 = arith.constant 1 : index
    %c0_132 = arith.constant 0 : index
    %c0_133 = arith.constant 0 : index
    %305 = vector.load %arg11[%c1_131, %c0_132, %c0_133] : memref<2x32x64xf32, #tpu.memory_space<vmem>>, vector<1x32x64xf32>
    %306 = vector.shape_cast %305 : vector<1x32x64xf32> to vector<32x64xf32>
    %cst_134 = arith.constant dense<0.000000e+00> : vector<8x64xf32>
    %307 = tpu.matmul %304, %306, %cst_134 {dimension_numbers = #tpu.dot_dimension_numbers<[1], [0], [0], [1], [0, 0, 1, 1], [], []>} : vector<8x32xf32>, vector<32x64xf32>, vector<8x64xf32> -> vector<8x64xf32>
    %c1_135 = arith.constant 1 : index
    %c0_136 = arith.constant 0 : index
    %c0_137 = arith.constant 0 : index
    %308 = vector.load %arg12[%c1_135, %c0_136, %c0_137] : memref<2x1x64xf32, #tpu.memory_space<vmem>>, vector<1x1x64xf32>
    %309 = vector.shape_cast %308 : vector<1x1x64xf32> to vector<1x64xf32>
    %310 = vector.broadcast %309 : vector<1x64xf32> to vector<8x64xf32>
    %311 = arith.addf %307, %310 : vector<8x64xf32>
    %cst_138 = arith.constant 0.000000e+00 : f32
    %312 = vector.broadcast %cst_138 : f32 to vector<8x64xf32>
    %313 = arith.maximumf %311, %312 : vector<8x64xf32>
    %c1_139 = arith.constant 1 : index
    %c0_140 = arith.constant 0 : index
    %c0_141 = arith.constant 0 : index
    %314 = vector.load %arg13[%c1_139, %c0_140, %c0_141] : memref<2x64x32xf32, #tpu.memory_space<vmem>>, vector<1x64x32xf32>
    %315 = vector.shape_cast %314 : vector<1x64x32xf32> to vector<64x32xf32>
    %cst_142 = arith.constant dense<0.000000e+00> : vector<8x32xf32>
    %316 = tpu.matmul %313, %315, %cst_142 {dimension_numbers = #tpu.dot_dimension_numbers<[1], [0], [0], [1], [0, 0, 1, 1], [], []>} : vector<8x64xf32>, vector<64x32xf32>, vector<8x32xf32> -> vector<8x32xf32>
    %c1_143 = arith.constant 1 : index
    %c0_144 = arith.constant 0 : index
    %c0_145 = arith.constant 0 : index
    %317 = vector.load %arg14[%c1_143, %c0_144, %c0_145] : memref<2x1x32xf32, #tpu.memory_space<vmem>>, vector<1x1x32xf32>
    %318 = vector.shape_cast %317 : vector<1x1x32xf32> to vector<1x32xf32>
    %319 = vector.broadcast %318 : vector<1x32xf32> to vector<8x32xf32>
    %320 = arith.addf %316, %319 : vector<8x32xf32>
    %321 = arith.addf %304, %320 : vector<8x32xf32>
    %c1_146 = arith.constant 1 : index
    %c0_147 = arith.constant 0 : index
    %c0_148 = arith.constant 0 : index
    %322 = vector.load %arg15[%c1_146, %c0_147, %c0_148] : memref<2x1x32xf32, #tpu.memory_space<vmem>>, vector<1x1x32xf32>
    %323 = vector.shape_cast %322 : vector<1x1x32xf32> to vector<1x32xf32>
    %c1_149 = arith.constant 1 : index
    %c0_150 = arith.constant 0 : index
    %c0_151 = arith.constant 0 : index
    %324 = vector.load %arg16[%c1_149, %c0_150, %c0_151] : memref<2x1x32xf32, #tpu.memory_space<vmem>>, vector<1x1x32xf32>
    %325 = vector.shape_cast %324 : vector<1x1x32xf32> to vector<1x32xf32>
    %cst_152 = arith.constant dense<0.000000e+00> : vector<8xf32>
    %326 = vector.multi_reduction <add>, %321, %cst_152 [1] : vector<8x32xf32> to vector<8xf32>
    %327 = vector.shape_cast %326 : vector<8xf32> to vector<8x1xf32>
    %cst_153 = arith.constant 3.200000e+01 : f32
    %328 = vector.broadcast %cst_153 : f32 to vector<8x1xf32>
    %329 = arith.divf %327, %328 : vector<8x1xf32>
    %330 = vector.broadcast %329 : vector<8x1xf32> to vector<8x32xf32>
    %331 = arith.subf %321, %330 : vector<8x32xf32>
    %332 = arith.mulf %331, %331 : vector<8x32xf32>
    %cst_154 = arith.constant dense<0.000000e+00> : vector<8xf32>
    %333 = vector.multi_reduction <add>, %332, %cst_154 [1] : vector<8x32xf32> to vector<8xf32>
    %334 = vector.shape_cast %333 : vector<8xf32> to vector<8x1xf32>
    %cst_155 = arith.constant 3.200000e+01 : f32
    %335 = vector.broadcast %cst_155 : f32 to vector<8x1xf32>
    %336 = arith.divf %334, %335 : vector<8x1xf32>
    %337 = vector.broadcast %329 : vector<8x1xf32> to vector<8x32xf32>
    %338 = arith.subf %321, %337 : vector<8x32xf32>
    %cst_156 = arith.constant 9.99999974E-6 : f32
    %339 = vector.broadcast %cst_156 : f32 to vector<8x1xf32>
    %340 = arith.addf %336, %339 : vector<8x1xf32>
    %341 = math.rsqrt %340 : vector<8x1xf32>
    %342 = vector.broadcast %341 : vector<8x1xf32> to vector<8x32xf32>
    %343 = arith.mulf %338, %342 : vector<8x32xf32>
    %344 = vector.broadcast %323 : vector<1x32xf32> to vector<8x32xf32>
    %345 = arith.mulf %343, %344 : vector<8x32xf32>
    %346 = vector.broadcast %325 : vector<1x32xf32> to vector<8x32xf32>
    %347 = arith.addf %345, %346 : vector<8x32xf32>
    %c0_157 = arith.constant 0 : index
    %c0_158 = arith.constant 0 : index
    %348 = vector.load %arg17[%c0_157, %c0_158] : memref<32x128xf32, #tpu.memory_space<vmem>>, vector<32x128xf32>
    %cst_159 = arith.constant dense<0.000000e+00> : vector<8x128xf32>
    %349 = tpu.matmul %347, %348, %cst_159 {dimension_numbers = #tpu.dot_dimension_numbers<[1], [0], [0], [1], [0, 0, 1, 1], [], []>} : vector<8x32xf32>, vector<32x128xf32>, vector<8x128xf32> -> vector<8x128xf32>
    %c0_160 = arith.constant 0 : index
    %c0_161 = arith.constant 0 : index
    %350 = vector.load %arg18[%c0_160, %c0_161] : memref<1x128xf32, #tpu.memory_space<vmem>>, vector<1x128xf32>
    %351 = vector.broadcast %350 : vector<1x128xf32> to vector<8x128xf32>
    %352 = arith.addf %349, %351 : vector<8x128xf32>
    %c0_162 = arith.constant 0 : index
    %c0_163 = arith.constant 0 : index
    %c0_164 = arith.constant 0 : index
    %353 = vector.load %arg19[%c0_162, %c0_163, %c0_164] : memref<1x8x128xf32, #tpu.memory_space<vmem>>, vector<1x8x128xf32>
    %354 = vector.shape_cast %353 : vector<1x8x128xf32> to vector<8x128xf32>
    %355 = vector.shape_cast %352 : vector<8x128xf32> to vector<1x8x128xf32>
    tpu.vector_store %arg19[%c0_162, %c0_163, %c0_164], %355 {strides = array<i32>} : memref<1x8x128xf32, #tpu.memory_space<vmem>>, vector<1x8x128xf32>,
    return
  }
  func.func @transform_0(%arg0: i32) -> (i32, i32, i32) {
    %c0_i32 = arith.constant 0 : i32
    %c0_i32_0 = arith.constant 0 : i32
    %c0_i32_1 = arith.constant 0 : i32
    return %arg0, %c0_i32, %c0_i32_0 : i32, i32, i32
  }
  func.func @transform_1(%arg0: i32) -> (i32, i32, i32) {
    %c0_i32 = arith.constant 0 : i32
    %c0_i32_0 = arith.constant 0 : i32
    %c0_i32_1 = arith.constant 0 : i32
    return %arg0, %c0_i32, %c0_i32_0 : i32, i32, i32
  }
  func.func @transform_2(%arg0: i32) -> (i32, i32, i32) {
    %c0_i32 = arith.constant 0 : i32
    %c0_i32_0 = arith.constant 0 : i32
    %c0_i32_1 = arith.constant 0 : i32
    return %arg0, %c0_i32, %c0_i32_0 : i32, i32, i32
  }
  func.func @transform_3(%arg0: i32) -> (i32, i32, i32) {
    %c0_i32 = arith.constant 0 : i32
    %c0_i32_0 = arith.constant 0 : i32
    %c0_i32_1 = arith.constant 0 : i32
    return %arg0, %c0_i32, %c0_i32_0 : i32, i32, i32
  }
  func.func @transform_4(%arg0: i32) -> (i32, i32, i32) {
    %c0_i32 = arith.constant 0 : i32
    %c0_i32_0 = arith.constant 0 : i32
    %c0_i32_1 = arith.constant 0 : i32
    %c0_i32_2 = arith.constant 0 : i32
    return %c0_i32, %c0_i32_0, %c0_i32_1 : i32, i32, i32
  }
  func.func @transform_5(%arg0: i32) -> (i32, i32, i32) {
    %c0_i32 = arith.constant 0 : i32
    %c0_i32_0 = arith.constant 0 : i32
    %c0_i32_1 = arith.constant 0 : i32
    %c0_i32_2 = arith.constant 0 : i32
    return %c0_i32, %c0_i32_0, %c0_i32_1 : i32, i32, i32
  }
  func.func @transform_6(%arg0: i32) -> (i32, i32, i32) {
    %c0_i32 = arith.constant 0 : i32
    %c0_i32_0 = arith.constant 0 : i32
    %c0_i32_1 = arith.constant 0 : i32
    %c0_i32_2 = arith.constant 0 : i32
    return %c0_i32, %c0_i32_0, %c0_i32_1 : i32, i32, i32
  }
  func.func @transform_7(%arg0: i32) -> (i32, i32, i32) {
    %c0_i32 = arith.constant 0 : i32
    %c0_i32_0 = arith.constant 0 : i32
    %c0_i32_1 = arith.constant 0 : i32
    %c0_i32_2 = arith.constant 0 : i32
    return %c0_i32, %c0_i32_0, %c0_i32_1 : i32, i32, i32
  }
  func.func @transform_8(%arg0: i32) -> (i32, i32, i32) {
    %c0_i32 = arith.constant 0 : i32
    %c0_i32_0 = arith.constant 0 : i32
    %c0_i32_1 = arith.constant 0 : i32
    %c0_i32_2 = arith.constant 0 : i32
    return %c0_i32, %c0_i32_0, %c0_i32_1 : i32, i32, i32
  }
  func.func @transform_9(%arg0: i32) -> (i32, i32, i32) {
    %c0_i32 = arith.constant 0 : i32
    %c0_i32_0 = arith.constant 0 : i32
    %c0_i32_1 = arith.constant 0 : i32
    %c0_i32_2 = arith.constant 0 : i32
    return %c0_i32, %c0_i32_0, %c0_i32_1 : i32, i32, i32
  }
  func.func @transform_10(%arg0: i32) -> (i32, i32, i32) {
    %c0_i32 = arith.constant 0 : i32
    %c0_i32_0 = arith.constant 0 : i32
    %c0_i32_1 = arith.constant 0 : i32
    %c0_i32_2 = arith.constant 0 : i32
    return %c0_i32, %c0_i32_0, %c0_i32_1 : i32, i32, i32
  }
  func.func @transform_11(%arg0: i32) -> (i32, i32, i32) {
    %c0_i32 = arith.constant 0 : i32
    %c0_i32_0 = arith.constant 0 : i32
    %c0_i32_1 = arith.constant 0 : i32
    %c0_i32_2 = arith.constant 0 : i32
    return %c0_i32, %c0_i32_0, %c0_i32_1 : i32, i32, i32
  }
  func.func @transform_12(%arg0: i32) -> (i32, i32, i32) {
    %c0_i32 = arith.constant 0 : i32
    %c0_i32_0 = arith.constant 0 : i32
    %c0_i32_1 = arith.constant 0 : i32
    %c0_i32_2 = arith.constant 0 : i32
    return %c0_i32, %c0_i32_0, %c0_i32_1 : i32, i32, i32
  }
  func.func @transform_13(%arg0: i32) -> (i32, i32, i32) {
    %c0_i32 = arith.constant 0 : i32
    %c0_i32_0 = arith.constant 0 : i32
    %c0_i32_1 = arith.constant 0 : i32
    %c0_i32_2 = arith.constant 0 : i32
    return %c0_i32, %c0_i32_0, %c0_i32_1 : i32, i32, i32
  }
  func.func @transform_14(%arg0: i32) -> (i32, i32, i32) {
    %c0_i32 = arith.constant 0 : i32
    %c0_i32_0 = arith.constant 0 : i32
    %c0_i32_1 = arith.constant 0 : i32
    %c0_i32_2 = arith.constant 0 : i32
    return %c0_i32, %c0_i32_0, %c0_i32_1 : i32, i32, i32
  }
  func.func @transform_15(%arg0: i32) -> (i32, i32, i32) {
    %c0_i32 = arith.constant 0 : i32
    %c0_i32_0 = arith.constant 0 : i32
    %c0_i32_1 = arith.constant 0 : i32
    %c0_i32_2 = arith.constant 0 : i32
    return %c0_i32, %c0_i32_0, %c0_i32_1 : i32, i32, i32
  }
  func.func @transform_16(%arg0: i32) -> (i32, i32) {
    %c0_i32 = arith.constant 0 : i32
    %c0_i32_0 = arith.constant 0 : i32
    %c0_i32_1 = arith.constant 0 : i32
    return %c0_i32, %c0_i32_0 : i32, i32
  }
  func.func @transform_17(%arg0: i32) -> (i32, i32) {
    %c0_i32 = arith.constant 0 : i32
    %c0_i32_0 = arith.constant 0 : i32
    %c0_i32_1 = arith.constant 0 : i32
    return %c0_i32, %c0_i32_0 : i32, i32
  }
  func.func @transform_18(%arg0: i32) -> (i32, i32, i32) {
    %c0_i32 = arith.constant 0 : i32
    %c0_i32_0 = arith.constant 0 : i32
    %c0_i32_1 = arith.constant 0 : i32
    return %arg0, %c0_i32, %c0_i32_0 : i32, i32, i32
  }
}

</mosaic_0001>

<bundles_post_ra>
// kernel: primitive_model_forward.1
= control target key start
LH: loop header
LB: loop body
LE: loop exit
PB: predicated region body
PF: predicated region fallthrough
CT: control target
= control target key end

     0   :  { %s2741_s0 = inlined_call_operand.vmem [shape: f32[2,8,32], index: 0, kind: input, shape index: {}]   ;;  %s2742_s1 = inlined_call_operand.vmem [shape: f32[2,8,32], index: 1, kind: input, shape index: {}]   ;;  %s2743_s2 = inlined_call_operand.vmem [shape: f32[2,8,32], index: 2, kind: input, shape index: {}]   ;;  %s2744_s3 = inlined_call_operand.vmem [shape: f32[2,1,32], index: 3, kind: input, shape index: {}]   ;;  %s2745_s4 = inlined_call_operand.vmem [shape: f32[2,32,96], index: 4, kind: input, shape index: {}]   ;;  %s2746_s5 = inlined_call_operand.vmem [shape: f32[2,1,96], index: 5, kind: input, shape index: {}]   ;;  %s2747_s6 = inlined_call_operand.vmem [shape: f32[2,32,32], index: 6, kind: input, shape index: {}]   ;;  %s2748_s7 = inlined_call_operand.vmem [shape: f32[2,1,32], index: 7, kind: input, shape index: {}]   ;;  %s2749_s8 = inlined_call_operand.vmem [shape: f32[2,1,32], index: 8, kind: input, shape index: {}]   ;;  %s2750_s9 = inlined_call_operand.vmem [shape: f32[2,1,32], index: 9, kind: input, shape index: {}]   ;;  %s2751_s10 = inlined_call_operand.vmem [shape: f32[2,32,64], index: 10, kind: input, shape index: {}]   ;;  %s2752_s11 = inlined_call_operand.vmem [shape: f32[2,1,64], index: 11, kind: input, shape index: {}]   ;;  %s2753_s12 = inlined_call_operand.vmem [shape: f32[2,64,32], index: 12, kind: input, shape index: {}]   ;;  %s2754_s13 = inlined_call_operand.vmem [shape: f32[2,1,32], index: 13, kind: input, shape index: {}]   ;;  %s2755_s14 = inlined_call_operand.vmem [shape: f32[2,1,32], index: 14, kind: input, shape index: {}]   ;;  %s2756_s15 = inlined_call_operand.vmem [shape: f32[2,1,32], index: 15, kind: input, shape index: {}]   ;;  %s2757_s16 = inlined_call_operand.vmem [shape: f32[32,128], index: 16, kind: input, shape index: {}]   ;;  %s2758_s17 = inlined_call_operand.vmem [shape: f32[1,128], index: 17, kind: input, shape index: {}]   ;;  %s2759_s18 = inlined_call_operand.hbm [shape: f32[2,8,128], index: 18, kind: output, shape index: {}]  }
   0x1   :  { %2775 = sst [smem:[#allocation14_spill]] %s2741_s0 }
   0x2   :  { %2776 = sst [smem:[#allocation15_spill]] %s2742_s1 }
   0x3   :  { %2777 = sst [smem:[#allocation16_spill]] %s2743_s2 }
   0x4   :  { %2778 = sst [smem:[#allocation17_spill]] %s2758_s17 }
   0x5   :  { %2779 = sst [smem:[#allocation18_spill]] %s2759_s18 }
   0x6   :  { %23 = vsyncpa [#allocation3], 0 }
   0x7   :  { %25 = vsyncpa [#allocation3 + $0x1], 0  ;;  %s2323_s27 = smov 0   ;;  %s2325_s28 = smov 0  }
   0x8   :  { %s2327_s29 = smov 0   ;;  %s2329_s30 = smov 0  }
   0x9 LB: > { %2780 = sst [smem:[#allocation5_spill]] %s2201_s27  ;;  %s2344_s0 = sadd.s32 4294967295, %s2213_s30   ;;  %s2213_s30 = sphi %s2329_s30, %s2806_s30   ;;  %s2209_s29 = sphi %s2327_s29, %s2809_s29   ;;  %s2205_s28 = sphi %s2325_s28, %s2808_s28   ;;  %s2201_s27 = sphi %s2323_s27, %s2807_s27  }
   0xa   : > { %2781 = sst [smem:[#allocation6_spill]] %s2205_s28  ;;  %s1960_s19 = sadd.s32 4294967294, %s2213_s30  }
   0xb   : > { %2782 = sst [smem:[#allocation7_spill]] %s2209_s29  ;;  %s2348_s1 = sadd.s32 1, %s2213_s30  }
   0xc   : > { %2783 = sst [smem:[#allocation8_spill]] %s2213_s30  ;;  %s436_s20 = sadd.s32 1, %s2209_s29 }
   0xd   : > { %2784 = sst [smem:[#allocation9_spill]] %s2344_s0  ;;  %s433_s21 = ssub.s32 %s2213_s30, %s2348_s1 }
   0xe   : > { %2785 = sst [smem:[#allocation10_spill]] %s2348_s1  ;;  %p446_p0 = scmp.ne.s32.totalorder %s2209_s29, %s2205_s28 }
   0xf   : > { %p434_p1 = scmp.eq.s32.totalorder %s433_s21, 0  ;;  %p447_p2 = scmp.eq.s32.totalorder %s2344_s0, 1 }
  0x10   : > { %p452_p3 = scmp.ne.s32.totalorder %s2205_s28, %s2201_s27  ;;  %p453_p4 = scmp.eq.s32.totalorder %s1960_s19, 1 }
  0x11   : > { %s2359_s22 = scalar_select %p434_p1, %s2209_s29, %s436_s20  }
  0x12   : > { %p2361_p5 = por %p447_p2, %p446_p0  ;;  %p2365_p6 = por %p453_p4, %p452_p3 }
  0x13   : > { %2786 = sst [smem:[#allocation11_spill]] %s2359_s22  ;;  %p1963_p7 = scmp.ge.s32.totalorder %s2213_s30, 1 }
  0x14   : > { %s2787_s2 = scalar_select %p2361_p5, 1, 0 }
  0x15   : > { %s2789_s23 = scalar_select %p2365_p6, 1, 0 }
  0x16   : > { %2788 = sst [smem:[#allocation12_spill]] %s2787_s2  ;;  %p540_p8 = scmp.lt.s32.totalorder %s2213_s30, 3 }
  0x17   : > { %2790 = sst [smem:[#allocation13_spill]] %s2789_s23 }
  0x18   : > { %p541_p9 = pnand %p1963_p7, %p540_p8 }
  0x19   : > { %p604_p10 = scmp.lt.s32.totalorder (!%p541_p9), %s2344_s0, 1  ;;  %s2791_s20 = sld [smem:[#allocation14_spill]] (!%p541_p9) }
  0x1a   : > { %544 = sbr.rel (%p541_p9) target bundleno = 4159 (0x103f), region = 92  ;;  %s2792_s29 = sld [smem:[#allocation15_spill]] (!%p541_p9) }
  0x1b   : > { %s2216_s18 = smov (!%p541_p9), 88   ;;  %s2218_s30 = smov (!%p541_p9), 96  }
  0x1c   : > { %s2221_s2 = smov (!%p541_p9), 104   ;;  %s2222_s23 = smov (!%p541_p9), 80  }
  0x1d   : > { %s2773_s19 = smov (!%p541_p9), 56  }
  0x1f   : > { %v641_v0 = vld [vmem:[%s2745_s4 + $0x18] sm:$0xff]  ;;  %v640_v1 = vld [vmem:[%s2745_s4 + $0x10] sm:$0xff]  ;;  %v624_v2 = vlaneseq  ;;  %v639_v3 = vld [vmem:[%s2745_s4 + $0x8] sm:$0xff]  ;;  %s605_s1 = scalar_select %p604_p10, %s2344_s0, 1  ;;  %v2215_v7 = vmov 0.0   ;;  %vm646_vm2 = vcmask 261120  }
  0x20   : > { %662 = vmatpush.msra.mxu0 %v641_v0  ;;  %v638_v4 = vld [vmem:[%s2745_s4] sm:$0xff]  ;;  %s2793_s0 = sld [smem:[#allocation16_spill]]  ;;  %vm678_vm3 = vcmask 64512  }
  0x21   : > { %v625_v5 = vshrl.u32 %v624_v2, 7  ;;  %v635_v6 = vand.u32 127, %v624_v2  ;;  %s1965_s24 = sshll.u32 %s605_s1, 3  ;;  %s618_s26 = scalar_lea.vmem %s2744_s3, %s605_s1  ;;  %v2092_v18 = vld [vmem:[%s2746_s5] ss:$0 sm:$0xff] }
  0x22   : > { %663 = vmatpush.msra.mxu0 %v640_v1  ;;  %s607_s21 = scalar_lea.vmem %s2791_s20, %s1965_s24  ;;  %s611_s22 = scalar_lea.vmem %s2792_s29, %s1965_s24  ;;  %v2091_v9 = vld [vmem:[%s618_s26] ss:$0 sm:$0xff] }
  0x23   : > { %vm626_vm0 = vcmp.eq.s32.totalorder %v625_v5, 0  ;;  %vm636_vm1 = vcmp.gt.s32.totalorder %v635_v6, %v625_v5  ;;  %v619_v10 = vld [vmem:[%s607_s21] sm:$0xff]  ;;  %s2220_s1 = smov 72   ;;  %s2771_s20 = smov 40  }
  0x24   : > { %664 = vmatpush.msra.mxu0 %v639_v3  ;;  %v627_v8 = vsel %vm626_vm0, 1.0, %v2215_v7  ;;  %v620_v11 = vld [vmem:[%s611_s22] sm:$0xff]  ;;  %v2397_v12 = vsel %vm636_vm1, -1e+30, %v2215_v7  ;;  %s2772_s21 = smov 48   ;;  %s2800_s26 = sld [smem:[#allocation18_spill]] }
  0x25   : > { %v621_v13 = vadd.f32 %v620_v11, %v619_v10  ;;  %v632_v15 = vmul.f32 %v2091_v9, %v627_v8  ;;  %v671_v22 = vld [vmem:[%s2747_s6] sm:$0xff] }
  0x26   : > { %s615_s28 = scalar_lea.vmem %s2793_s0, %s1965_s24  ;;  %665 = vmatpush.msra.mxu0 %v638_v4  ;;  %s2219_s0 = smov 120   ;;  %873 = vmatpush.msra.mxu3 %v671_v22 }
  0x27   : > { %v622_v14 = vld [vmem:[%s615_s28] sm:$0xff]  ;;  %s2217_s28 = smov 64   ;;  %s2774_s24 = smov 112  }
  0x28   : > { %v623_v16 = vadd.f32 %v622_v14, %v621_v13 }
  0x2a   : > { %v2399_v17 = vadd.f32 %v632_v15, %v623_v16  ;;  %s2171_s25 = scalar_lea.hbm %s2800_s26, 16 }
  0x2c   : > { %1968 = vmatmul.msk.f32.vlgmr.msra.gmra.mxu0 %vm646_vm2, %v2399_v17 }
  0xa9   : > { %v667_v19 = vpop.f32.mrf.mxu0 }
  0xaa   : > { %v2406_v20 = vadd.f32 %v2092_v18, %v667_v19  ;;  %v672_v18 = vld [vmem:[%s2747_s6 + $0x8] sm:$0xff] }
  0xac   : > { %756 = vrot.lane.b32.xlu2 %v2406_v20, %s2216_s18  ;;  %713 = vrot.lane.b32.xlu1 %v2406_v20, %s2217_s28  ;;  %v670_v21 = vmul.f32 0.35355338, %v2406_v20 }
  0xad   : > { %676 = vrot.lane.b32.xlu0 %v2406_v20, %s2218_s30 }
  0xb4   : > { %754 = vrot.lane.b32.xlu2 %v670_v21, %s2219_s0 }
  0xbc   : > { %982 = vrot.lane.b32.xlu2 %v2406_v20, %s2220_s1 }
  0xc4   : > { %980 = vrot.lane.b32.xlu2 %v670_v21, %s2221_s2 }
  0xcc   : > { %880 = vrot.lane.b32.xlu2 %v2406_v20, %s2222_s23 }
  0xd4   : > { %878 = vrot.lane.b32.xlu2 %v670_v21, %s2774_s24 }
 0x106   : > { %v757_v23 = vpop.permute.xlu2 %756 }
 0x10e   : > { %v755_v24 = vpop.permute.xlu2 %754 }
 0x116   : > { %v983_v25 = vpop.permute.xlu2 %982 }
 0x117   : > { %1981 = vmatpush.xpose.msk.msrb.mxu3 %vm678_vm3, %v983_v25 }
 0x11e   : > { %v714_v26 = vpop.permute.xlu1 %713  ;;  %v981_v27 = vpop.permute.xlu2 %980 }
 0x11f   : > { %v677_v28 = vpop.permute.xlu0 %676  ;;  %734 = vmatpush.msra.mxu2 %v714_v26 }
 0x120   : > { %1969 = vmatpush.xpose.msk.msra.mxu1 %vm678_vm3, %v677_v28 }
 0x121   : > { %1972 = vmatpush.xpose.msk.msrb.mxu2 %vm678_vm3, %v757_v23 }
 0x123   : > { %1970 = vmatmul.msk.f32.vlgmr.msra.gmra.mxu1 %vm678_vm3, %v670_v21 }
 0x124   : > { %850 = vmatpush.msrb.mxu1 %v672_v18 }
 0x126   : > { %v881_v29 = vpop.permute.xlu2 %880 }
 0x127   : > { %1977 = vmatpush.xpose.msk.msrb.mxu0 %vm678_vm3, %v881_v29 }
 0x12e   : > { %v879_v30 = vpop.permute.xlu2 %878 }
 0x12f   : > { %1978 = vmatmul.msk.f32.vlgmr.msrb.gmra.mxu0 %vm678_vm3, %v879_v30 }
 0x1a0   : > { %v701_v31 = vpop.f32.mrf.mxu1 }
 0x1a1   : > { %v702_v32 = vadd.f32 %v701_v31, %v2397_v12 }
 0x1a3   : > { %v704_v33 = vsel %vm678_vm3, %v702_v32, -inf }
 0x1a4   : > { %705 = vmax.xlane.f32.xlu0 %v704_v33 }
 0x1ac   : > { %v903_v34 = vpop.f32.mrf.mxu0 }
 0x1ad   : > { %v904_v35 = vadd.f32 %v903_v34, %v2397_v12  ;;  %v673_v34 = vld [vmem:[%s2747_s6 + $0x10] sm:$0xff] }
 0x1ae   : > { %974 = vmatpush.msra.mxu1 %v673_v34 }
 0x1af   : > { %v906_v36 = vsel %vm678_vm3, %v904_v35, -inf }
 0x1b0   : > { %907 = vmax.xlane.f32.xlu0 %v906_v36 }
 0x1c4   : > { %791 = vrot.lane.b32.xlu0 %v2406_v20, %s2773_s19 }
 0x1cc   : > { %1017 = vrot.lane.b32.xlu0 %v2406_v20, %s2771_s20 }
 0x217   : > { %v706_v37 = vpop.xlane.xlu0 %705 }
 0x218   : > { %v707_v38 = vsub.f32 %v702_v32, %v706_v37  ;;  %v674_v32 = vld [vmem:[%s2747_s6 + $0x18] sm:$0xff] }
 0x21a   : > { %v708_v39 = vmul.f32 1.442695, %v707_v38 }
 0x21c   : > { %2109 = vpow2.f32 %v708_v39 }
 0x222   : > { %v2110_v40 = vpop.eup %2109 }
 0x223   : > { %1971 = vmatmul.msk.f32.vlgmr.msra.gmra.mxu2 %vm678_vm3, %v2110_v40  ;;  %v710_v41 = vsel %vm678_vm3, %v2110_v40, 0.0  ;;  %v908_v42 = vpop.xlane.xlu0 %907 }
 0x224   : > { %711 = vadd.xlane.f32.xlu1 %v710_v41  ;;  %v909_v56 = vsub.f32 %v904_v35, %v908_v42 }
 0x226   : > { %v910_v59 = vmul.f32 1.442695, %v909_v56 }
 0x22b   : > { %1973 = vmatmul.msk.f32.vlgmr.msrb.gmra.mxu2 %vm678_vm3, %v755_v24 }
 0x236   : > { %v792_v43 = vpop.permute.xlu0 %791 }
 0x237   : > { %812 = vmatpush.msra.mxu2 %v792_v43 }
 0x23e   : > { %v1018_v44 = vpop.permute.xlu0 %1017 }
 0x23f   : > { %1038 = vmatpush.msra.mxu0 %v1018_v44 }
 0x297   : > { %v712_v45 = vpop.xlane.xlu1 %711 }
 0x298   : > { %2111 = vrcp.f32 %v712_v45  ;;  %v750_v49 = vand.u32 2147483648, %v712_v45  ;;  %v748_v51 = vand.u32 2147483647, %v712_v45  ;;  %vm744_vm5 = vweird.f32 %v712_v45 }
 0x299   : > { %2113 = vpow2.f32 %v910_v59 }
 0x29a   : > { %v751_v54 = vor.u32 1.1754944e-38, %v750_v49  ;;  %vm749_vm7 = vcmp.eq.f32.partialorder %v748_v51, 8.507059e+37 }
 0x29e   : > { %v2112_v46 = vpop.eup %2111 }
 0x29f   : > { %v740_v47 = vmul.f32 %v2112_v46, %v712_v45  ;;  %vm745_vm4 = vweird.f32 %v2112_v46  ;;  %v2114_v63 = vpop.eup %2113 }
 0x2a0   : > { %vm746_vm6 = vmor %vm744_vm5, %vm745_vm4  ;;  %v912_v0 = vsel %vm678_vm3, %v2114_v63, 0.0 }
 0x2a1   : > { %v741_v48 = vsub.f32 1.0, %v740_v47 }
 0x2a3   : > { %v742_v50 = vmul.f32 %v2112_v46, %v741_v48 }
 0x2a5   : > { %v743_v52 = vadd.f32 %v2112_v46, %v742_v50 }
 0x2a6   : > { %v736_v53 = vpop.f32.mrf.mxu2 }
 0x2a7   : > { %v747_v55 = vsel %vm746_vm6, %v2112_v46, %v743_v52 }
 0x2a8   : > { %v752_v57 = vsel %vm749_vm7, %v751_v54, %v747_v55 }
 0x2a9   : > { %v753_v58 = vmul.f32 %v752_v57, %v736_v53 }
 0x2ab   : > { %1976 = vmatmul.msk.f32.vlgmr.msra.gmra.mxu3 %vm678_vm3, %v753_v58 }
 0x2ae   : > { %v779_v60 = vpop.f32.mrf.mxu2 }
 0x2af   : > { %v780_v61 = vadd.f32 %v779_v60, %v2397_v12 }
 0x2b1   : > { %v782_v62 = vsel %vm678_vm3, %v780_v61, -inf }
 0x2b2   : > { %783 = vmax.xlane.f32.xlu2 %v782_v62 }
 0x2b3   : > { %1982 = vmatmul.msk.f32.vlgmr.msrb.gmra.mxu3 %vm678_vm3, %v981_v27 }
 0x2ba   : > { %913 = vadd.xlane.f32.xlu2 %v912_v0  ;;  %v2093_v0 = vld [vmem:[%s2748_s7] ss:$0 sm:$0xff] }
 0x325   : > { %v784_v1 = vpop.xlane.xlu2 %783 }
 0x326   : > { %v785_v2 = vsub.f32 %v780_v61, %v784_v1 }
 0x328   : > { %v786_v3 = vmul.f32 1.442695, %v785_v2 }
 0x32a   : > { %2115 = vpow2.f32 %v786_v3 }
 0x32d   : > { %v914_v33 = vpop.xlane.xlu2 %913 }
 0x32e   : > { %v2447_v4 = vpop.f32.mrf.mxu3  ;;  %v952_v53 = vand.u32 2147483648, %v914_v33  ;;  %vm946_vm1 = vweird.f32 %v914_v33  ;;  %v950_v54 = vand.u32 2147483647, %v914_v33 }
 0x330   : > { %v2116_v5 = vpop.eup %2115  ;;  %v953_v56 = vor.u32 1.1754944e-38, %v952_v53  ;;  %vm951_vm5 = vcmp.eq.f32.partialorder %v950_v54, 8.507059e+37 }
 0x331   : > { %1974 = vmatmul.msk.f32.vlgmr.msra.gmra.mxu2 %vm678_vm3, %v2116_v5  ;;  %v788_v9 = vsel %vm678_vm3, %v2116_v5, 0.0 }
 0x336   : > { %v1005_v6 = vpop.f32.mrf.mxu3 }
 0x337   : > { %v1006_v7 = vadd.f32 %v1005_v6, %v2397_v12 }
 0x339   : > { %v1008_v8 = vsel %vm678_vm3, %v1006_v7, -inf }
 0x33a   : > { %1009 = vmax.xlane.f32.xlu1 %v1008_v8 }
 0x353   : > { %915 = vrot.lane.b32.xlu1 %v2406_v20, %s2772_s21 }
 0x37d   : > { %789 = vadd.xlane.f32.xlu1 %v788_v9 }
 0x3ad   : > { %v1010_v10 = vpop.xlane.xlu1 %1009 }
 0x3ae   : > { %v1011_v11 = vsub.f32 %v1006_v7, %v1010_v10  ;;  %v2227_v7 = vmov 32.0  }
 0x3b0   : > { %v1012_v13 = vmul.f32 1.442695, %v1011_v11 }
 0x3b2   : > { %2117 = vpow2.f32 %v1012_v13 }
 0x3b4   : > { %v814_v29 = vpop.f32.mrf.mxu2 }
 0x3b8   : > { %v2118_v14 = vpop.eup %2117 }
 0x3b9   : > { %1983 = vmatmul.msk.f32.vlgmr.msra.gmra.mxu0 %vm678_vm3, %v2118_v14  ;;  %v1014_v15 = vsel %vm678_vm3, %v2118_v14, 0.0 }
 0x3ba   : > { %1015 = vadd.xlane.f32.xlu0 %v1014_v15 }
 0x3c5   : > { %v916_v16 = vpop.permute.xlu1 %915 }
 0x3c6   : > { %936 = vmatpush.msrb.mxu2 %v916_v16 }
 0x3c7   : > { %1979 = vmatmul.msk.f32.vlgmr.msrb.gmra.mxu2 %vm678_vm3, %v2114_v63 }
 0x3c8   : > { %1076 = vmatpush.msra.mxu2 %v674_v32 }
 0x3f0   : > { %v790_v19 = vpop.xlane.xlu1 %789 }
 0x3f1   : > { %2119 = vrcp.f32 %v790_v19  ;;  %v828_v23 = vand.u32 2147483648, %v790_v19  ;;  %v826_v25 = vand.u32 2147483647, %v790_v19  ;;  %vm822_vm9 = vweird.f32 %v790_v19 }
 0x3f2   : > { %2121 = vrcp.f32 %v914_v33 }
 0x3f3   : > { %v829_v27 = vor.u32 1.1754944e-38, %v828_v23  ;;  %vm827_vm11 = vcmp.eq.f32.partialorder %v826_v25, 8.507059e+37  ;;  %v1166_v23 = vld [vmem:[%s2753_s12 + $0x38] sm:$0xff]  ;;  %v1164_v25 = vld [vmem:[%s2753_s12 + $0x28] sm:$0xff] }
 0x3f4   : > { %1183 = vmatpush.msra.mxu3 %v1166_v23 }
 0x3f7   : > { %v2120_v20 = vpop.eup %2119 }
 0x3f8   : > { %v818_v21 = vmul.f32 %v2120_v20, %v790_v19  ;;  %vm823_vm8 = vweird.f32 %v2120_v20  ;;  %v2122_v36 = vpop.eup %2121  ;;  %v1130_v19 = vld [vmem:[%s2751_s10 + $0x18] sm:$0xff] }
 0x3f9   : > { %vm824_vm10 = vmor %vm822_vm9, %vm823_vm8  ;;  %v942_v39 = vmul.f32 %v2122_v36, %v914_v33  ;;  %vm947_vm0 = vweird.f32 %v2122_v36 }
 0x3fa   : > { %v819_v22 = vsub.f32 1.0, %v818_v21  ;;  %vm948_vm4 = vmor %vm946_vm1, %vm947_vm0  ;;  %v1128_v21 = vld [vmem:[%s2751_s10 + $0x8] sm:$0xff] }
 0x3fb   : > { %v943_v44 = vsub.f32 1.0, %v942_v39 }
 0x3fc   : > { %v820_v24 = vmul.f32 %v2120_v20, %v819_v22  ;;  %v1127_v22 = vld [vmem:[%s2751_s10] sm:$0xff] }
 0x3fd   : > { %v944_v51 = vmul.f32 %v2122_v36, %v943_v44  ;;  %v1160_v44 = vld [vmem:[%s2753_s12 + $0x8] sm:$0xff] }
 0x3fe   : > { %v821_v26 = vadd.f32 %v2120_v20, %v820_v24  ;;  %v1165_v24 = vld [vmem:[%s2753_s12 + $0x30] sm:$0xff] }
 0x3ff   : > { %v945_v52 = vadd.f32 %v2122_v36, %v944_v51  ;;  %1184 = vmatpush.msra.mxu3 %v1165_v24 }
 0x400   : > { %v825_v28 = vsel %vm824_vm10, %v2120_v20, %v821_v26  ;;  %v1129_v20 = vld [vmem:[%s2751_s10 + $0x10] sm:$0xff]  ;;  %vm1171_vm10 = vcmask 523264  }
 0x401   : > { %v830_v30 = vsel %vm827_vm11, %v829_v27, %v825_v28  ;;  %v949_v55 = vsel %vm948_vm4, %v2122_v36, %v945_v52  ;;  %v1163_v28 = vld [vmem:[%s2753_s12 + $0x20] sm:$0xff]  ;;  %1185 = vmatpush.msra.mxu3 %v1164_v25 }
 0x402   : > { %v831_v31 = vmul.f32 %v830_v30, %v814_v29  ;;  %v954_v58 = vsel %vm951_vm5, %v953_v56, %v949_v55  ;;  %v1162_v30 = vld [vmem:[%s2753_s12 + $0x18] sm:$0xff] }
 0x403   : > { %1186 = vmatpush.msra.mxu3 %v1163_v28 }
 0x404   : > { %1975 = vmatmul.msk.f32.vlgmr.msrb.gmra.mxu1 %vm678_vm3, %v831_v31 }
 0x405   : > { %1150 = vmatpush.msrb.mxu1 %v1130_v19  ;;  %1187 = vmatpush.msra.mxu3 %v1162_v30 }
 0x407   : > { %1151 = vmatpush.msrb.mxu1 %v1129_v20 }
 0x409   : > { %1152 = vmatpush.msrb.mxu1 %v1128_v21  ;;  %v1993_v21 = vld [vmem:[%s2747_s6 + $0x20] sm:$0xff] }
 0x40b   : > { %1153 = vmatpush.msrb.mxu1 %v1127_v22 }
 0x42d   : > { %v1016_v35 = vpop.xlane.xlu0 %1015 }
 0x42e   : > { %2123 = vrcp.f32 %v1016_v35  ;;  %v1054_v41 = vand.u32 2147483648, %v1016_v35  ;;  %v1052_v43 = vand.u32 2147483647, %v1016_v35  ;;  %vm1048_vm13 = vweird.f32 %v1016_v35 }
 0x42f   : > { %2125 = vrcp.f32 %v2227_v7 }
 0x430   : > { %v1055_v46 = vor.u32 1.1754944e-38, %v1054_v41  ;;  %vm1053_vm15 = vcmp.eq.f32.partialorder %v1052_v43, 8.507059e+37  ;;  %v1161_v43 = vld [vmem:[%s2753_s12 + $0x10] sm:$0xff] }
 0x431   : > { %1188 = vmatpush.msra.mxu3 %v1161_v43 }
 0x433   : > { %1189 = vmatpush.msra.mxu3 %v1160_v44 }
 0x434   : > { %v2124_v37 = vpop.eup %2123 }
 0x435   : > { %v1044_v38 = vmul.f32 %v2124_v37, %v1016_v35  ;;  %vm1049_vm12 = vweird.f32 %v2124_v37  ;;  %v2126_v8 = vpop.eup %2125 }
 0x436   : > { %vm1050_vm14 = vmor %vm1048_vm13, %vm1049_vm12  ;;  %v1040_v48 = vpop.f32.mrf.mxu0  ;;  %v1094_v9 = vmul.f32 32.0, %v2126_v8  ;;  %vm1098_vm6 = vweird.f32 %v2126_v8 }
 0x437   : > { %v1045_v40 = vsub.f32 1.0, %v1044_v38 }
 0x438   : > { %v1095_v10 = vsub.f32 1.0, %v1094_v9 }
 0x439   : > { %v1046_v42 = vmul.f32 %v2124_v37, %v1045_v40  ;;  %v2095_v40 = vld [vmem:[%s2750_s9] ss:$0 sm:$0xff] }
 0x43b   : > { %v1047_v45 = vadd.f32 %v2124_v37, %v1046_v42 }
 0x43d   : > { %v1051_v47 = vsel %vm1050_vm14, %v2124_v37, %v1047_v45  ;;  %v2094_v37 = vld [vmem:[%s2749_s8] ss:$0 sm:$0xff] }
 0x43e   : > { %v1056_v49 = vsel %vm1053_vm15, %v1055_v46, %v1051_v47  ;;  %v1159_v45 = vld [vmem:[%s2753_s12] sm:$0xff] }
 0x43f   : > { %v1057_v50 = vmul.f32 %v1056_v49, %v1040_v48  ;;  %1190 = vmatpush.msra.mxu3 %v1159_v45  ;;  %v2096_v46 = vld [vmem:[%s2752_s11] ss:$0 sm:$0xff] }
 0x441   : > { %1984 = vmatmul.msk.f32.vlgmr.msra.gmra.mxu2 %vm678_vm3, %v1057_v50  ;;  %v2097_v50 = vld [vmem:[%s2754_s13] ss:$0 sm:$0xff]  ;;  %1464 = vmatpush.msrb.mxu3 %v1993_v21 }
 0x44a   : > { %v938_v57 = vpop.f32.mrf.mxu2 }
 0x44b   : > { %v955_v59 = vmul.f32 %v954_v58, %v938_v57 }
 0x44d   : > { %1980 = vmatmul.msk.f32.vlgmr.msra.gmra.mxu1 %vm678_vm3, %v955_v59 }
 0x481   : > { %v852_v60 = vpop.f32.mrf.mxu1 }
 0x482   : > { %v876_v61 = vadd.f32 %v2447_v4, %v852_v60  ;;  %v1096_v4 = vmul.f32 %v2126_v8, %v1095_v10  ;;  %v1990_v60 = vld [vmem:[%s2745_s4 + $0x38] sm:$0xff]  ;;  %v2098_v10 = vld [vmem:[%s2755_s14] ss:$0 sm:$0xff] }
 0x483   : > { %1253 = vmatpush.msrb.mxu0 %v1990_v60 }
 0x484   : > { %v1097_v11 = vadd.f32 %v2126_v8, %v1096_v4 }
 0x486   : > { %v2476_v13 = vsel %vm1098_vm6, %v2126_v8, %v1097_v11 }
 0x4c4   : > { %v1078_v1 = vpop.f32.mrf.mxu2 }
 0x4ca   : > { %v976_v62 = vpop.f32.mrf.mxu1 }
 0x4cb   : > { %v979_v63 = vadd.f32 %v976_v62, %v876_v61  ;;  %v1989_v61 = vld [vmem:[%s2745_s4 + $0x30] sm:$0xff]  ;;  %v1988_v62 = vld [vmem:[%s2745_s4 + $0x28] sm:$0xff] }
 0x4cc   : > { %1254 = vmatpush.msrb.mxu0 %v1989_v61 }
 0x4cd   : > { %v1081_v2 = vadd.f32 %v1078_v1, %v979_v63  ;;  %v1987_v63 = vld [vmem:[%s2745_s4 + $0x20] sm:$0xff] }
 0x4ce   : > { %1255 = vmatpush.msrb.mxu0 %v1988_v62 }
 0x4cf   : > { %v1086_v3 = vadd.f32 %v2093_v0, %v1081_v2 }
 0x4d0   : > { %1256 = vmatpush.msrb.mxu0 %v1987_v63 }
 0x4d1   : > { %v1087_v5 = vadd.f32 %v1086_v3, %v2399_v17 }
 0x4d3   : > { %v1090_v6 = vsel %vm646_vm2, %v1087_v5, 0.0 }
 0x4d4   : > { %1091 = vadd.xlane.f32.xlu2 %v1090_v6 }
 0x547   : > { %v1092_v14 = vpop.xlane.xlu2 %1091 }
 0x548   : > { %v1100_v15 = vmul.f32 %v2476_v13, %v1092_v14  ;;  %v2099_v14 = vld [vmem:[%s2756_s15] ss:$0 sm:$0xff] }
 0x54a   : > { %v1101_v16 = vsub.f32 %v1087_v5, %v1100_v15 }
 0x54c   : > { %v1102_v18 = vmul.f32 %v1101_v16, %v1101_v16 }
 0x54e   : > { %v1103_v17 = vsel %vm646_vm2, %v1102_v18, 0.0  ;;  %v2100_v18 = vld [vmem:[%s2746_s5 + $0x1] ss:$0 sm:$0xff] }
 0x54f   : > { %1104 = vadd.xlane.f32.xlu2 %v1103_v17 }
 0x5c2   : > { %v1105_v26 = vpop.xlane.xlu2 %1104 }
 0x5c3   : > { %v1106_v27 = vmul.f32 %v1105_v26, %v2476_v13 }
 0x5c5   : > { %v1107_v29 = vadd.f32 1e-05, %v1106_v27 }
 0x5c7   : > { %2127 = vrsqrt.f32 %v1107_v29  ;;  %vm1114_vm8 = vweird.f32 %v1107_v29 }
 0x5cd   : > { %v2128_v31 = vpop.eup %2127 }
 0x5ce   : > { %v1109_v32 = vmul.f32 %v2128_v31, %v1107_v29  ;;  %vm1115_vm7 = vweird.f32 %v2128_v31 }
 0x5cf   : > { %vm1116_vm9 = vmor %vm1114_vm8, %vm1115_vm7 }
 0x5d0   : > { %v1110_v33 = vmul.f32 %v2128_v31, %v1109_v32 }
 0x5d2   : > { %v1111_v34 = vmul.f32 0.5, %v1110_v33 }
 0x5d4   : > { %v1112_v35 = vsub.f32 1.5, %v1111_v34 }
 0x5d6   : > { %v1113_v36 = vmul.f32 %v2128_v31, %v1112_v35 }
 0x5d8   : > { %v1117_v38 = vsel %vm1116_vm9, %v2128_v31, %v1113_v36 }
 0x5d9   : > { %v1118_v39 = vmul.f32 %v1117_v38, %v1101_v16 }
 0x5db   : > { %v1122_v41 = vmul.f32 %v2094_v37, %v1118_v39 }
 0x5dd   : > { %v1126_v42 = vadd.f32 %v2095_v40, %v1122_v41 }
 0x5df   : > { %1985 = vmatmul.msk.f32.vlgmr.msrb.gmra.mxu1 %vm646_vm2, %v1126_v42 }
 0x65c   : > { %v1155_v47 = vpop.f32.mrf.mxu1 }
 0x65d   : > { %v1156_v48 = vadd.f32 %v2096_v46, %v1155_v47 }
 0x65f   : > { %v1158_v49 = vmax.f32 %v1156_v48, 0.0 }
 0x661   : > { %1986 = vmatmul.msk.f32.vlgmr.msra.gmra.mxu3 %vm1171_vm10, %v1158_v49 }
 0x6e4   : > { %v1192_v51 = vpop.f32.mrf.mxu3 }
 0x6e5   : > { %v1193_v52 = vadd.f32 %v2097_v50, %v1192_v51 }
 0x6e7   : > { %v1195_v53 = vadd.f32 %v1193_v52, %v1126_v42 }
 0x6e9   : > { %v1198_v54 = vsel %vm646_vm2, %v1195_v53, 0.0 }
 0x6ea   : > { %1199 = vadd.xlane.f32.xlu2 %v1198_v54 }
 0x75d   : > { %v1200_v55 = vpop.xlane.xlu2 %1199 }
 0x75e   : > { %v1201_v56 = vmul.f32 %v1200_v55, %v2476_v13 }
 0x760   : > { %v1202_v57 = vsub.f32 %v1195_v53, %v1201_v56 }
 0x762   : > { %v1203_v58 = vmul.f32 %v1202_v57, %v1202_v57 }
 0x764   : > { %v1204_v59 = vsel %vm646_vm2, %v1203_v58, 0.0 }
 0x765   : > { %1205 = vadd.xlane.f32.xlu2 %v1204_v59 }
 0x7d8   : > { %v1206_v0 = vpop.xlane.xlu2 %1205 }
 0x7d9   : > { %v1207_v1 = vmul.f32 %v1206_v0, %v2476_v13 }
 0x7db   : > { %v1208_v2 = vadd.f32 1e-05, %v1207_v1 }
 0x7dd   : > { %2129 = vrsqrt.f32 %v1208_v2  ;;  %vm1215_vm12 = vweird.f32 %v1208_v2 }
 0x7e3   : > { %v2130_v3 = vpop.eup %2129 }
 0x7e4   : > { %v1210_v5 = vmul.f32 %v2130_v3, %v1208_v2  ;;  %vm1216_vm11 = vweird.f32 %v2130_v3 }
 0x7e5   : > { %vm1217_vm13 = vmor %vm1215_vm12, %vm1216_vm11 }
 0x7e6   : > { %v1211_v6 = vmul.f32 %v2130_v3, %v1210_v5 }
 0x7e8   : > { %v1212_v7 = vmul.f32 0.5, %v1211_v6  ;;  %v1994_v6 = vld [vmem:[%s2747_s6 + $0x28] sm:$0xff] }
 0x7ea   : > { %v1213_v8 = vsub.f32 1.5, %v1212_v7 }
 0x7ec   : > { %v1214_v9 = vmul.f32 %v2130_v3, %v1213_v8 }
 0x7ee   : > { %v1218_v4 = vsel %vm1217_vm13, %v2130_v3, %v1214_v9 }
 0x7ef   : > { %v1219_v11 = vmul.f32 %v1218_v4, %v1202_v57 }
 0x7f1   : > { %v1223_v15 = vmul.f32 %v2098_v10, %v1219_v11 }
 0x7f3   : > { %v2553_v16 = vadd.f32 %v2099_v14, %v1223_v15 }
 0x7f5   : > { %1992 = vmatmul.msk.f32.vlgmr.msrb.gmra.mxu0 %vm646_vm2, %v2553_v16 }
 0x872   : > { %v1258_v17 = vpop.f32.mrf.mxu0 }
 0x873   : > { %v2560_v19 = vadd.f32 %v2100_v18, %v1258_v17 }
 0x875   : > { %1304 = vrot.lane.b32.xlu2 %v2560_v19, %s2217_s28  ;;  %1268 = vrot.lane.b32.xlu1 %v2560_v19, %s2218_s30  ;;  %v1261_v20 = vmul.f32 0.35355338, %v2560_v19  ;;  %s2795_s28 = smov 56   ;;  %s2796_s30 = smov 48  }
 0x87d   : > { %1573 = vrot.lane.b32.xlu2 %v2560_v19, %s2220_s1  ;;  %1345 = vrot.lane.b32.xlu1 %v1261_v20, %s2219_s0  ;;  %s2797_s0 = smov 40  }
 0x885   : > { %1471 = vrot.lane.b32.xlu2 %v2560_v19, %s2222_s23  ;;  %1571 = vrot.lane.b32.xlu1 %v1261_v20, %s2221_s2 }
 0x8cf   : > { %v1305_v22 = vpop.permute.xlu2 %1304 }
 0x8d0   : > { %1325 = vmatpush.msra.mxu1 %v1305_v22 }
 0x8d2   : > { %1441 = vmatpush.msrb.mxu1 %v1994_v6 }
 0x8d7   : > { %v1574_v23 = vpop.permute.xlu2 %1573 }
 0x8d8   : > { %2009 = vmatpush.xpose.msk.msra.mxu3 %vm678_vm3, %v1574_v23 }
 0x8df   : > { %v1472_v34 = vpop.permute.xlu2 %1471 }
 0x8e7   : > { %v1269_v24 = vpop.permute.xlu1 %1268 }
 0x8e8   : > { %1997 = vmatpush.xpose.msk.msrb.mxu2 %vm678_vm3, %v1269_v24 }
 0x8eb   : > { %1998 = vmatmul.msk.f32.vlgmr.msrb.gmra.mxu2 %vm678_vm3, %v1261_v20 }
 0x8ef   : > { %v1346_v35 = vpop.permute.xlu1 %1345 }
 0x8f7   : > { %v1572_v53 = vpop.permute.xlu1 %1571 }
 0x96e   : > { %v1292_v25 = vpop.f32.mrf.mxu2 }
 0x96f   : > { %v1293_v26 = vadd.f32 %v1292_v25, %v2397_v12 }
 0x971   : > { %v1295_v27 = vsel %vm678_vm3, %v1293_v26, -inf }
 0x972   : > { %1296 = vmax.xlane.f32.xlu0 %v1295_v27 }
 0x986   : > { %1347 = vrot.lane.b32.xlu0 %v2560_v19, %s2216_s18  ;;  %s2794_s18 = smov 112  }
 0x9e5   : > { %v1297_v28 = vpop.xlane.xlu0 %1296 }
 0x9e6   : > { %v1298_v29 = vsub.f32 %v1293_v26, %v1297_v28 }
 0x9e8   : > { %v1299_v30 = vmul.f32 1.442695, %v1298_v29 }
 0x9ea   : > { %2131 = vpow2.f32 %v1299_v30 }
 0x9f0   : > { %v2132_v31 = vpop.eup %2131 }
 0x9f1   : > { %1999 = vmatmul.msk.f32.vlgmr.msra.gmra.mxu1 %vm678_vm3, %v2132_v31  ;;  %v1301_v32 = vsel %vm678_vm3, %v2132_v31, 0.0  ;;  %v1995_v31 = vld [vmem:[%s2747_s6 + $0x30] sm:$0xff] }
 0x9f2   : > { %1302 = vadd.xlane.f32.xlu0 %v1301_v32  ;;  %1565 = vmatpush.msra.mxu1 %v1995_v31 }
 0x9f8   : > { %v1348_v33 = vpop.permute.xlu0 %1347 }
 0x9f9   : > { %2000 = vmatpush.xpose.msk.msra.mxu0 %vm678_vm3, %v1348_v33  ;;  %v1996_v33 = vld [vmem:[%s2747_s6 + $0x38] sm:$0xff] }
 0x9fc   : > { %2001 = vmatmul.msk.f32.vlgmr.msra.gmra.mxu0 %vm678_vm3, %v1346_v35 }
 0x9fd   : > { %2005 = vmatpush.xpose.msk.msrb.mxu0 %vm678_vm3, %v1472_v34 }
 0xa06   : > { %1469 = vrot.lane.b32.xlu0 %v1261_v20, %s2794_s18  ;;  %s2802_s18 = sld [smem:[#allocation17_spill]] }
 0xa65   : > { %v1303_v36 = vpop.xlane.xlu0 %1302 }
 0xa66   : > { %2133 = vrcp.f32 %v1303_v36  ;;  %v1341_v40 = vand.u32 2147483648, %v1303_v36  ;;  %v1339_v42 = vand.u32 2147483647, %v1303_v36  ;;  %vm1335_vm15 = vweird.f32 %v1303_v36 }
 0xa68   : > { %v1342_v44 = vor.u32 1.1754944e-38, %v1341_v40  ;;  %vm1340_vm1 = vcmp.eq.f32.partialorder %v1339_v42, 8.507059e+37 }
 0xa6c   : > { %v2134_v37 = vpop.eup %2133 }
 0xa6d   : > { %v1331_v38 = vmul.f32 %v2134_v37, %v1303_v36  ;;  %vm1336_vm14 = vweird.f32 %v2134_v37 }
 0xa6e   : > { %vm1337_vm0 = vmor %vm1335_vm15, %vm1336_vm14  ;;  %v1327_v46 = vpop.f32.mrf.mxu1 }
 0xa6f   : > { %v1332_v39 = vsub.f32 1.0, %v1331_v38 }
 0xa71   : > { %v1333_v41 = vmul.f32 %v2134_v37, %v1332_v39 }
 0xa73   : > { %v1334_v43 = vadd.f32 %v2134_v37, %v1333_v41 }
 0xa75   : > { %v1338_v45 = vsel %vm1337_vm0, %v2134_v37, %v1334_v43 }
 0xa76   : > { %v1343_v47 = vsel %vm1340_vm1, %v1342_v44, %v1338_v45 }
 0xa77   : > { %v1344_v48 = vmul.f32 %v1343_v47, %v1327_v46 }
 0xa78   : > { %v1470_v49 = vpop.permute.xlu0 %1469 }
 0xa79   : > { %v1370_v50 = vpop.f32.mrf.mxu0  ;;  %2004 = vmatmul.msk.f32.vlgmr.msrb.gmra.mxu3 %vm678_vm3, %v1344_v48  ;;  %2006 = vmatmul.msk.f32.vlgmr.msrb.gmra.mxu0 %vm678_vm3, %v1470_v49 }
 0xa7a   : > { %v1371_v51 = vadd.f32 %v1370_v50, %v2397_v12 }
 0xa7c   : > { %v1373_v52 = vsel %vm678_vm3, %v1371_v51, -inf }
 0xa7d   : > { %1374 = vmax.xlane.f32.xlu1 %v1373_v52 }
 0xa81   : > { %2010 = vmatmul.msk.f32.vlgmr.msra.gmra.mxu3 %vm678_vm3, %v1572_v53 }
 0xa96   : > { %1382 = vrot.lane.b32.xlu1 %v2560_v19, %s2795_s28  ;;  %s2798_s28 = sld [smem:[#allocation6_spill]] }
 0xa9c   : > { %s601_s29 = sand.u32 1, %s2798_s28  }
 0xa9d   : > { %s1964_s22 = sshll.u32 %s601_s29, 3  ;;  %s1853_s28 = scalar_lea.sflag [#allocation3], %s601_s29 }
 0xaf0   : > { %v1375_v54 = vpop.xlane.xlu1 %1374 }
 0xaf1   : > { %v1376_v55 = vsub.f32 %v1371_v51, %v1375_v54 }
 0xaf3   : > { %v1377_v56 = vmul.f32 1.442695, %v1376_v55 }
 0xaf5   : > { %2135 = vpow2.f32 %v1377_v56 }
 0xaf6   : > { %v1494_v57 = vpop.f32.mrf.mxu0 }
 0xaf7   : > { %v1495_v58 = vadd.f32 %v1494_v57, %v2397_v12 }
 0xaf9   : > { %v1497_v59 = vsel %vm678_vm3, %v1495_v58, -inf }
 0xafa   : > { %1498 = vmax.xlane.f32.xlu2 %v1497_v59 }
 0xafb   : > { %v2136_v60 = vpop.eup %2135 }
 0xafc   : > { %v2598_v61 = vpop.f32.mrf.mxu3  ;;  %v1379_v62 = vsel %vm678_vm3, %v2136_v60, 0.0 }
 0xafd   : > { %1380 = vadd.xlane.f32.xlu1 %v1379_v62 }
 0xb04   : > { %v1596_v63 = vpop.f32.mrf.mxu3 }
 0xb05   : > { %v1597_v0 = vadd.f32 %v1596_v63, %v2397_v12 }
 0xb07   : > { %v1599_v1 = vsel %vm678_vm3, %v1597_v0, -inf }
 0xb08   : > { %v1383_v2 = vpop.permute.xlu1 %1382  ;;  %1600 = vmax.xlane.f32.xlu0 %v1599_v1 }
 0xb09   : > { %1403 = vmatpush.msra.mxu2 %v1383_v2 }
 0xb0a   : > { %2002 = vmatmul.msk.f32.vlgmr.msra.gmra.mxu2 %vm678_vm3, %v2136_v60 }
 0xb12   : > { %1506 = vrot.lane.b32.xlu2 %v2560_v19, %s2796_s30  ;;  %s2799_s30 = sld [smem:[#allocation9_spill]] }
 0xb18   : > { %s2036_s17 = sshll.u32 %s2799_s30, 3 }
 0xb19   : > { %s1863_s21 = scalar_lea.hbm %s2800_s26, %s2036_s17 }
 0xb1a   : > { %s1867_s2 = sshll.u32 %s1863_s21, 4  ;;  %s1868_s2 = int_to_ptr.hbm [resolvable:$true] %s1867_s2 }
 0xb1b   : > { %s2165_s23 = sshra.s32 %s1868_s2, 4  ;;  %s2166_s23 = int_to_ptr.hbm [resolvable:$true] %s2165_s23 }
 0xb1c   : > { %1608 = vrot.lane.b32.xlu0 %v2560_v19, %s2797_s0  ;;  %s603_s0 = scalar_lea.vmem [#allocation2], %s1964_s22  ;;  %s2167_s30 = scalar_lea.hbm %s2166_s23, 8 }
 0xb1d   : > { %s1865_s1 = sshll.u32 %s603_s0, 4  ;;  %p2168_p11 = scmp.ne.s32.totalorder %s2166_s23, %s2167_s30  ;;  %s1866_s1 = int_to_ptr.vmem [resolvable:$true] %s1865_s1 }
 0xb1e   : > { %p2172_p0 = scmp.lt.s32.totalorder %s2166_s23, %s2800_s26  ;;  %p2173_p1 = scmp.lt.s32.totalorder %s2171_s25, %s2167_s30 }
 0xb1f   : > { %p2169_p12 = pnand %p2168_p11, %p2361_p5 }
 0xb20   : > { %p2174_p2 = por %p2173_p1, %p2172_p0 }
 0xb21   : > { %p2170_p13 = pneg %p2169_p12 }
 0xb23   : > { %p2175_p3 = pnand %p2174_p2, %p2170_p13 }
 0xb6d   : > { %v1499_v3 = vpop.xlane.xlu2 %1498 }
 0xb6e   : > { %v1500_v5 = vsub.f32 %v1495_v58, %v1499_v3 }
 0xb70   : > { %v1501_v12 = vmul.f32 1.442695, %v1500_v5  ;;  %v1381_v7 = vpop.xlane.xlu1 %1380 }
 0xb71   : > { %2137 = vrcp.f32 %v1381_v7  ;;  %v1419_v23 = vand.u32 2147483648, %v1381_v7  ;;  %vm1413_vm5 = vweird.f32 %v1381_v7  ;;  %v1417_v24 = vand.u32 2147483647, %v1381_v7 }
 0xb72   : > { %2139 = vpow2.f32 %v1501_v12 }
 0xb73   : > { %v1420_v26 = vor.u32 1.1754944e-38, %v1419_v23  ;;  %vm1418_vm7 = vcmp.eq.f32.partialorder %v1417_v24, 8.507059e+37 }
 0xb75   : > { %v1507_v8 = vpop.permute.xlu2 %1506 }
 0xb76   : > { %1527 = vmatpush.msrb.mxu2 %v1507_v8 }
 0xb77   : > { %v2138_v9 = vpop.eup %2137 }
 0xb78   : > { %v2140_v10 = vpop.eup %2139  ;;  %v1409_v11 = vmul.f32 %v2138_v9, %v1381_v7  ;;  %vm1414_vm4 = vweird.f32 %v2138_v9  ;;  %1667 = vmatpush.msra.mxu2 %v1996_v33 }
 0xb79   : > { %2007 = vmatmul.msk.f32.vlgmr.msrb.gmra.mxu2 %vm678_vm3, %v2140_v10  ;;  %v1503_v4 = vsel %vm678_vm3, %v2140_v10, 0.0  ;;  %vm1415_vm6 = vmor %vm1413_vm5, %vm1414_vm4  ;;  %v2019_v10 = vld [vmem:[%s2751_s10 + $0x38] sm:$0xff] }
 0xb7a   : > { %1504 = vadd.xlane.f32.xlu2 %v1503_v4  ;;  %v1410_v18 = vsub.f32 1.0, %v1409_v11  ;;  %v2017_v4 = vld [vmem:[%s2751_s10 + $0x28] sm:$0xff]  ;;  %v2016_v11 = vld [vmem:[%s2751_s10 + $0x20] sm:$0xff] }
 0xb7b   : > { %v1601_v14 = vpop.xlane.xlu0 %1600 }
 0xb7c   : > { %v1602_v15 = vsub.f32 %v1597_v0, %v1601_v14  ;;  %v1411_v19 = vmul.f32 %v2138_v9, %v1410_v18  ;;  %v2101_v0 = vld [vmem:[%s2748_s7 + $0x1] ss:$0 sm:$0xff]  ;;  %v2029_v14 = vld [vmem:[%s2753_s12 + $0x78] sm:$0xff]  ;;  %v2027_v18 = vld [vmem:[%s2753_s12 + $0x68] sm:$0xff] }
 0xb7d   : > { %1773 = vmatpush.msrb.mxu3 %v2029_v14 }
 0xb7e   : > { %v1603_v17 = vmul.f32 1.442695, %v1602_v15  ;;  %v1412_v21 = vadd.f32 %v2138_v9, %v1411_v19  ;;  %v2028_v15 = vld [vmem:[%s2753_s12 + $0x70] sm:$0xff] }
 0xb7f   : > { %1774 = vmatpush.msrb.mxu3 %v2028_v15 }
 0xb80   : > { %2141 = vpow2.f32 %v1603_v17  ;;  %v1416_v25 = vsel %vm1415_vm6, %v2138_v9, %v1412_v21 }
 0xb81   : > { %v1421_v28 = vsel %vm1418_vm7, %v1420_v26, %v1416_v25  ;;  %1775 = vmatpush.msrb.mxu3 %v2027_v18 }
 0xb86   : > { %v2142_v20 = vpop.eup %2141 }
 0xb87   : > { %v1605_v22 = vsel %vm678_vm3, %v2142_v20, 0.0 }
 0xb88   : > { %1606 = vadd.xlane.f32.xlu0 %v1605_v22  ;;  %v2025_v22 = vld [vmem:[%s2753_s12 + $0x58] sm:$0xff] }
 0xb8d   : > { %v1405_v27 = vpop.f32.mrf.mxu2 }
 0xb8e   : > { %v1422_v29 = vmul.f32 %v1421_v28, %v1405_v27  ;;  %v1609_v30 = vpop.permute.xlu0 %1608 }
 0xb8f   : > { %1629 = vmatpush.msra.mxu0 %v1609_v30 }
 0xb90   : > { %2003 = vmatmul.msk.f32.vlgmr.msrb.gmra.mxu1 %vm678_vm3, %v1422_v29  ;;  %2011 = vmatmul.msk.f32.vlgmr.msra.gmra.mxu0 %vm678_vm3, %v2142_v20  ;;  %v2026_v20 = vld [vmem:[%s2753_s12 + $0x60] sm:$0xff] }
 0xb91   : > { %1739 = vmatpush.msrb.mxu1 %v2019_v10  ;;  %1776 = vmatpush.msrb.mxu3 %v2026_v20  ;;  %v2102_v29 = vld [vmem:[%s2749_s8 + $0x1] ss:$0 sm:$0xff] }
 0xb93   : > { %1777 = vmatpush.msrb.mxu3 %v2025_v22 }
 0xbed   : > { %v1505_v32 = vpop.xlane.xlu2 %1504 }
 0xbee   : > { %2143 = vrcp.f32 %v1505_v32  ;;  %v1543_v37 = vand.u32 2147483648, %v1505_v32  ;;  %v1541_v39 = vand.u32 2147483647, %v1505_v32  ;;  %vm1537_vm9 = vweird.f32 %v1505_v32 }
 0xbf0   : > { %v1544_v42 = vor.u32 1.1754944e-38, %v1543_v37  ;;  %vm1542_vm12 = vcmp.eq.f32.partialorder %v1541_v39, 8.507059e+37  ;;  %v2022_v37 = vld [vmem:[%s2753_s12 + $0x40] sm:$0xff] }
 0xbf4   : > { %v2144_v34 = vpop.eup %2143 }
 0xbf5   : > { %v1533_v35 = vmul.f32 %v2144_v34, %v1505_v32  ;;  %vm1538_vm8 = vweird.f32 %v2144_v34  ;;  %v2103_v32 = vld [vmem:[%s2750_s9 + $0x1] ss:$0 sm:$0xff] }
 0xbf6   : > { %vm1539_vm11 = vmor %vm1537_vm9, %vm1538_vm8 }
 0xbf7   : > { %v1534_v36 = vsub.f32 1.0, %v1533_v35  ;;  %v2024_v35 = vld [vmem:[%s2753_s12 + $0x50] sm:$0xff] }
 0xbf8   : > { %1778 = vmatpush.msrb.mxu3 %v2024_v35 }
 0xbf9   : > { %v1535_v38 = vmul.f32 %v2144_v34, %v1534_v36  ;;  %v2023_v36 = vld [vmem:[%s2753_s12 + $0x48] sm:$0xff] }
 0xbfa   : > { %1779 = vmatpush.msrb.mxu3 %v2023_v36 }
 0xbfb   : > { %v1607_v40 = vpop.xlane.xlu0 %1606  ;;  %v1536_v41 = vadd.f32 %v2144_v34, %v1535_v38  ;;  %v2104_v38 = vld [vmem:[%s2752_s11 + $0x1] ss:$0 sm:$0xff] }
 0xbfc   : > { %2145 = vrcp.f32 %v1607_v40  ;;  %v1529_v44 = vpop.f32.mrf.mxu2  ;;  %v1645_v50 = vand.u32 2147483648, %v1607_v40  ;;  %v1643_v52 = vand.u32 2147483647, %v1607_v40  ;;  %vm1639_vm14 = vweird.f32 %v1607_v40  ;;  %1780 = vmatpush.msrb.mxu3 %v2022_v37 }
 0xbfd   : > { %v1540_v43 = vsel %vm1539_vm11, %v2144_v34, %v1536_v41 }
 0xbfe   : > { %v1545_v45 = vsel %vm1542_vm12, %v1544_v42, %v1540_v43  ;;  %v1646_v54 = vor.u32 1.1754944e-38, %v1645_v50  ;;  %vm1644_vm0 = vcmp.eq.f32.partialorder %v1643_v52, 8.507059e+37  ;;  %v2105_v42 = vld [vmem:[%s2754_s13 + $0x1] ss:$0 sm:$0xff]  ;;  %v1823_v52 = vld [vmem:[%s2757_s16 + $0x18] sm:$0xff] }
 0xbff   : > { %v1546_v46 = vmul.f32 %v1545_v45, %v1529_v44  ;;  %1843 = vmatpush.msrb.mxu0 %v1823_v52 }
 0xc01   : > { %2008 = vmatmul.msk.f32.vlgmr.msra.gmra.mxu1 %vm678_vm3, %v1546_v46 }
 0xc02   : > { %v2146_v47 = vpop.eup %2145 }
 0xc03   : > { %v1635_v48 = vmul.f32 %v2146_v47, %v1607_v40  ;;  %vm1640_vm13 = vweird.f32 %v2146_v47 }
 0xc04   : > { %vm1641_vm15 = vmor %vm1639_vm14, %vm1640_vm13 }
 0xc05   : > { %v1636_v49 = vsub.f32 1.0, %v1635_v48 }
 0xc07   : > { %v1637_v51 = vmul.f32 %v2146_v47, %v1636_v49 }
 0xc09   : > { %v1638_v53 = vadd.f32 %v2146_v47, %v1637_v51 }
 0xc0b   : > { %v1642_v55 = vsel %vm1641_vm15, %v2146_v47, %v1638_v53  ;;  %v1822_v53 = vld [vmem:[%s2757_s16 + $0x10] sm:$0xff] }
 0xc0c   : > { %v1647_v56 = vsel %vm1644_vm0, %v1646_v54, %v1642_v55  ;;  %1844 = vmatpush.msrb.mxu0 %v1822_v53  ;;  %v1821_v54 = vld [vmem:[%s2757_s16 + $0x8] sm:$0xff]  ;;  %v1820_v55 = vld [vmem:[%s2757_s16] sm:$0xff] }
 0xc0d   : > { %v1631_v57 = vpop.f32.mrf.mxu0  ;;  %v1443_v59 = vpop.f32.mrf.mxu1 }
 0xc0e   : > { %v1648_v58 = vmul.f32 %v1647_v56, %v1631_v57  ;;  %v1467_v62 = vadd.f32 %v2598_v61, %v1443_v59  ;;  %1845 = vmatpush.msrb.mxu0 %v1821_v54 }
 0xc10   : > { %2012 = vmatmul.msk.f32.vlgmr.msra.gmra.mxu2 %vm678_vm3, %v1648_v58  ;;  %1846 = vmatpush.msrb.mxu0 %v1820_v55 }
 0xc7e   : > { %v1567_v60 = vpop.f32.mrf.mxu1 }
 0xc7f   : > { %v1570_v63 = vadd.f32 %v1567_v60, %v1467_v62 }
 0xc93   : > { %v1669_v1 = vpop.f32.mrf.mxu2 }
 0xc94   : > { %v1672_v2 = vadd.f32 %v1669_v1, %v1570_v63 }
 0xc96   : > { %v1678_v3 = vadd.f32 %v2101_v0, %v1672_v2  ;;  %v2106_v2 = vld [vmem:[%s2755_s14 + $0x1] ss:$0 sm:$0xff] }
 0xc98   : > { %v1679_v5 = vadd.f32 %v1678_v3, %v2553_v16  ;;  %v2018_v16 = vld [vmem:[%s2751_s10 + $0x30] sm:$0xff] }
 0xc99   : > { %1740 = vmatpush.msrb.mxu1 %v2018_v16 }
 0xc9a   : > { %v1684_v6 = vsel %vm646_vm2, %v1679_v5, 0.0 }
 0xc9b   : > { %1685 = vadd.xlane.f32.xlu1 %v1684_v6  ;;  %1741 = vmatpush.msrb.mxu1 %v2017_v4 }
 0xc9d   : > { %1742 = vmatpush.msrb.mxu1 %v2016_v11 }
 0xd0e   : > { %v1686_v12 = vpop.xlane.xlu1 %1685 }
 0xd0f   : > { %v1687_v7 = vmul.f32 %v1686_v12, %v2476_v13 }
 0xd11   : > { %v1688_v8 = vsub.f32 %v1679_v5, %v1687_v7  ;;  %v2108_v7 = vld [vmem:[%s2802_s18] ss:$0 sm:$0xff] }
 0xd13   : > { %v1689_v9 = vmul.f32 %v1688_v8, %v1688_v8 }
 0xd15   : > { %v1690_v61 = vsel %vm646_vm2, %v1689_v9, 0.0 }
 0xd16   : > { %1691 = vadd.xlane.f32.xlu2 %v1690_v61 }
 0xd89   : > { %v1692_v17 = vpop.xlane.xlu2 %1691 }
 0xd8a   : > { %v1693_v19 = vmul.f32 %v1692_v17, %v2476_v13 }
 0xd8c   : > { %v1694_v21 = vadd.f32 1e-05, %v1693_v19 }
 0xd8e   : > { %2147 = vrsqrt.f32 %v1694_v21  ;;  %vm1701_vm1 = vweird.f32 %v1694_v21 }
 0xd94   : > { %v2148_v23 = vpop.eup %2147 }
 0xd95   : > { %v1696_v24 = vmul.f32 %v2148_v23, %v1694_v21  ;;  %vm1702_vm3 = vweird.f32 %v2148_v23 }
 0xd96   : > { %vm1703_vm4 = vmor %vm1701_vm1, %vm1702_vm3 }
 0xd97   : > { %v1697_v25 = vmul.f32 %v2148_v23, %v1696_v24 }
 0xd99   : > { %v1698_v26 = vmul.f32 0.5, %v1697_v25 }
 0xd9b   : > { %v1699_v27 = vsub.f32 1.5, %v1698_v26 }
 0xd9d   : > { %v1700_v28 = vmul.f32 %v2148_v23, %v1699_v27 }
 0xd9f   : > { %v1704_v30 = vsel %vm1703_vm4, %v2148_v23, %v1700_v28 }
 0xda0   : > { %v1705_v31 = vmul.f32 %v1704_v30, %v1688_v8 }
 0xda2   : > { %v1709_v33 = vmul.f32 %v2102_v29, %v1705_v31 }
 0xda4   : > { %v1713_v34 = vadd.f32 %v2103_v32, %v1709_v33 }
 0xda6   : > { %2021 = vmatmul.msk.f32.vlgmr.msrb.gmra.mxu1 %vm646_vm2, %v1713_v34 }
 0xe23   : > { %v1744_v39 = vpop.f32.mrf.mxu1 }
 0xe24   : > { %v1745_v40 = vadd.f32 %v2104_v38, %v1744_v39 }
 0xe26   : > { %v1747_v41 = vmax.f32 %v1745_v40, 0.0 }
 0xe28   : > { %2031 = vmatmul.msk.f32.vlgmr.msrb.gmra.mxu3 %vm1171_vm10, %v1747_v41 }
 0xeab   : > { %v1782_v43 = vpop.f32.mrf.mxu3 }
 0xeac   : > { %v1783_v44 = vadd.f32 %v2105_v42, %v1782_v43 }
 0xeae   : > { %v1785_v45 = vadd.f32 %v1783_v44, %v1713_v34 }
 0xeb0   : > { %v1790_v46 = vsel %vm646_vm2, %v1785_v45, 0.0 }
 0xeb1   : > { %1791 = vadd.xlane.f32.xlu0 %v1790_v46 }
 0xf24   : > { %v1792_v47 = vpop.xlane.xlu0 %1791 }
 0xf25   : > { %v1793_v48 = vmul.f32 %v1792_v47, %v2476_v13 }
 0xf27   : > { %v1794_v49 = vsub.f32 %v1785_v45, %v1793_v48 }
 0xf29   : > { %v1795_v50 = vmul.f32 %v1794_v49, %v1794_v49 }
 0xf2b   : > { %v1796_v51 = vsel %vm646_vm2, %v1795_v50, 0.0 }
 0xf2c   : > { %1797 = vadd.xlane.f32.xlu1 %v1796_v51 }
 0xf9f   : > { %v1798_v56 = vpop.xlane.xlu1 %1797 }
 0xfa0   : > { %v1799_v57 = vmul.f32 %v1798_v56, %v2476_v13  ;;  %v2107_v13 = vld [vmem:[%s2756_s15 + $0x1] ss:$0 sm:$0xff] }
 0xfa2   : > { %v1800_v58 = vadd.f32 1e-05, %v1799_v57 }
 0xfa4   : > { %2149 = vrsqrt.f32 %v1800_v58  ;;  %vm1807_vm5 = vweird.f32 %v1800_v58 }
 0xfaa   : > { %v2150_v59 = vpop.eup %2149 }
 0xfab   : > { %v1802_v60 = vmul.f32 %v2150_v59, %v1800_v58  ;;  %vm1808_vm10 = vweird.f32 %v2150_v59 }
 0xfac   : > { %vm1809_vm6 = vmor %vm1807_vm5, %vm1808_vm10 }
 0xfad   : > { %v1803_v62 = vmul.f32 %v2150_v59, %v1802_v60 }
 0xfaf   : > { %v1804_v63 = vmul.f32 0.5, %v1803_v62 }
 0xfb1   : > { %v1805_v0 = vsub.f32 1.5, %v1804_v63 }
 0xfb3   : > { %v1806_v1 = vmul.f32 %v2150_v59, %v1805_v0 }
 0xfb5   : > { %v1810_v3 = vsel %vm1809_vm6, %v2150_v59, %v1806_v1 }
 0xfb6   : > { %v1811_v5 = vmul.f32 %v1810_v3, %v1794_v49 }
 0xfb8   : > { %v1815_v6 = vmul.f32 %v2106_v2, %v1811_v5 }
 0xfba   : > { %v1819_v12 = vadd.f32 %v2107_v13, %v1815_v6 }
 0xfbc   : > { %2034 = vmatmul.msk.f32.vlgmr.msrb.gmra.mxu0 %vm646_vm2, %v1819_v12 }
0x1039   : > { %v1848_v8 = vpop.f32.mrf.mxu0 }
0x103a   : > { %v1849_v9 = vadd.f32 %v2108_v7, %v1848_v8 }
0x103c   : > { %1851 = vst [vmem:[%s603_s0] sm:$0xff] %v1849_v9 }
0x103d   : > { %2178 = shalt.err (!%p2175_p3)
}
0x103e   : > { %2039 = dma.vmem_to_hbm [thread:$0]  (%p2361_p5), %s1866_s1, 128, %s1868_s2, %s1853_s28  }
0x103f PF: > { %s2803_s29 = sld [smem:[#allocation8_spill]] }
0x1040   : > { %s2804_s21 = sld [smem:[#allocation5_spill]] }
0x1045   : > { %p2045_p4 = scmp.ge.s32.totalorder %s2803_s29, 2 }
0x1046   : > { %s1879_s18 = sand.u32 1, %s2804_s21  }
0x1047   : > { %p2042_p7 = pnand %p2045_p4, %p2365_p6  ;;  %s1880_s0 = scalar_lea.sflag [#allocation3], %s1879_s18 }
0x1049   : > { %p2043_p8 = pneg %p2042_p7 }
0x104b   : > { %2196 = dma.done.wait (%p2043_p8), %s1880_s0, 128  }
0x104c   : > { %2198 = vsyncadd (%p2043_p8), %s1880_s0, 4294967168  ;;  %s2806_s30 = sld [smem:[#allocation10_spill]] }
0x104d   : > { %s2807_s27 = sld [smem:[#allocation6_spill]] }
0x104e   : > { %s2808_s28 = sld [smem:[#allocation7_spill]] }
0x104f   : > { %s2809_s29 = sld [smem:[#allocation11_spill]] }
0x1052   : > { %p28_p9 = scmp.ge.s32.totalorder %s2806_s30, 4  }
0x1054   :  { %30 = sbr.rel (!%p28_p9) target bundleno = 9 (0x9), region = 148 }
0x1059   :  { %1886 = vsyncpa [#allocation3], 1 }
0x105a   :  { %1888 = vsyncpa [#allocation3 + $0x1], 1 }

</bundles_post_ra>
